<compile_context>
chip_gen: v7x
topology: tpu7x:2x2x1
jax: 0.10.0
libtpu: 0.0.40
codegen_flags: <defaults>
</compile_context>

<pallas_src>
import functools

import jax
import jax.numpy as jnp
from jax import lax
from jax.experimental import pallas as pl
from jax.experimental.pallas import tpu as pltpu


SUBLANE, LANE = 8, 128


def _round_up(x, m):
    return (x + m - 1) // m * m


def _vmem_budget_bytes():
    """~70% of physical VMEM (90 MB on v5e/v6e, ~45 MB on v7x); safe fallback."""
    try:
        cap = pltpu.get_tpu_info().vmem_capacity_bytes
        return min(int(0.70 * cap), 100 * 1024 * 1024)
    except Exception:
        return 48 * 1024 * 1024


def _pick_batch_block(B):
    """Batch rows per kernel instance: as tall as possible for the MXU, but
    keep >=2 batch blocks when the batch allows (v7x megacore, batch axis is
    the only parallel grid dim)."""
    Bp0 = _round_up(B, SUBLANE)
    if Bp0 > 2 * LANE:
        b_blk = LANE
    elif Bp0 > SUBLANE:
        b_blk = _round_up((B + 1) // 2, SUBLANE)   # split into 2 blocks
    else:
        b_blk = SUBLANE
    return b_blk, _round_up(B, b_blk)


def _pick_t_tile(t_req, T, b_blk, I, Hp, Dp, mm_bytes, budget):
    """Target ~1024 rows for the hoisted-projection / deferred-FC matmuls,
    then shrink until the whole tile fits the VMEM budget."""
    t = (max(8, 1024 // b_blk) if t_req is None else max(1, t_req))
    t = min(t, T)

    def usage(tt):
        rows = tt * b_blk
        return (2 * ((I + Hp) * 3 * Hp + Hp * Dp) * mm_bytes   # weights, 2 buffers
                + 2 * (3 * Hp + Hp + Dp) * 4                   # biases, 2 buffers
                + b_blk * Hp * 4                               # h carry
                + 2 * rows * I * mm_bytes                      # x double buffer
                + 2 * rows * Dp * 4                            # out double buffer
                + rows * 3 * Hp * 4                            # gi scratch
                + rows * Hp * 4)                               # hs scratch

    while t > 1 and usage(t) > 0.85 * budget:
        t = max(1, t // 2)
    return t


def _gru_fc_kernel(x_ref, wih_ref, whh_ref, bcomb_ref, bhhn_ref, wfc_ref, bfc_ref,
                   out_ref, h_carry, gi_ref, hs_ref, *, hp, t_tile, b_blk, unroll):
    """One grid step = one (batch-block, time-tile).

    x_ref    : (T_TILE, B_BLK, I)   matmul dtype (time-major)
    wih_ref  : (I, 3*Hp)            matmul dtype  (gate order r|z|n, per-gate padded)
    whh_ref  : (Hp, 3*Hp)           matmul dtype
    bcomb_ref: (1, 3*Hp)  f32       (b_ih+b_hh for r,z ; b_ih for n)
    bhhn_ref : (1, Hp)    f32       (b_hh for n, applied inside tanh after r-mask)
    wfc_ref  : (Hp, Dp)             matmul dtype
    bfc_ref  : (1, Dp)    f32
    out_ref  : (T_TILE, B_BLK, Dp)  f32
    h_carry  : (B_BLK, Hp)          f32 VMEM scratch, persists across time-tiles
    gi_ref   : (T_TILE*B_BLK, 3*Hp) f32 VMEM scratch (hoisted input projection)
    hs_ref   : (T_TILE*B_BLK, Hp)   f32 VMEM scratch (hidden-state history)
    """
    # NOTE: correctness of this carry relies on the time axis being the
    # innermost grid axis and marked "arbitrary" (sequential); do not reorder
    # the grid or change dimension_semantics without revisiting this init.
    @pl.when(pl.program_id(1) == 0)
    def _init():
        h_carry[...] = jnp.zeros_like(h_carry)

    md = wih_ref.dtype

    # (1) Hoisted input projection: ONE tall MXU matmul for the whole tile.
    x_flat = x_ref[...].reshape(t_tile * b_blk, x_ref.shape[-1])
    gi = jnp.dot(x_flat, wih_ref[...], preferred_element_type=jnp.float32)
    gi_ref[...] = gi + bcomb_ref[...]

    whh = whh_ref[...]
    # Hoisted broadcast (JAX does not CSE broadcast_in_dim inside the unrolled loop).
    bhh_nb = jnp.broadcast_to(bhhn_ref[...], (b_blk, hp))

    # (2) The true recurrence: only h @ W_hh + gate math per step.
    def step(t, h):
        row0 = pl.multiple_of(t * b_blk, b_blk)
        gi_t = gi_ref[pl.ds(row0, b_blk), :]                        # (B_BLK, 3Hp)
        gh = jnp.dot(h.astype(md), whh,
                     preferred_element_type=jnp.float32)            # (B_BLK, 3Hp)
        r = jax.nn.sigmoid(gi_t[:, 0:hp] + gh[:, 0:hp])
        z = jax.nn.sigmoid(gi_t[:, hp:2 * hp] + gh[:, hp:2 * hp])
        n = jnp.tanh(gi_t[:, 2 * hp:3 * hp] + r * (gh[:, 2 * hp:3 * hp] + bhh_nb))
        h_new = n + z * (h - n)                                     # == (1-z)*n + z*h
        hs_ref[pl.ds(row0, b_blk), :] = h_new
        return h_new

    h_final = lax.fori_loop(0, t_tile, step, h_carry[...], unroll=unroll)
    h_carry[...] = h_final

    # (3) Deferred FC: one tall matmul + one lane-dense store for the whole tile.
    out = jnp.dot(hs_ref[...].astype(md), wfc_ref[...],
                  preferred_element_type=jnp.float32) + bfc_ref[...]
    out_ref[...] = out.reshape(t_tile, b_blk, -1).astype(out_ref.dtype)


def gru_model_forward(x, params, *, t_tile=None, matmul_dtype=jnp.bfloat16):
    """x: (B, T, I) float32 -> (B, T, D) float32.  Matches PyTorchGRUModel.forward.

    matmul_dtype=bfloat16 (default) feeds the MXU bf16 operands with f32
    accumulation; h-carry and gate math stay f32. Pass jnp.float32 for exact-ish
    f32 matmuls.
    """
    B, T, I = x.shape
    w_ih, w_hh, b_ih, b_hh, w_fc, b_fc = (
        params["w_ih"], params["w_hh"], params["b_ih"],
        params["b_hh"], params["w_fc"], params["b_fc"])
    H = w_hh.shape[1]
    D = w_fc.shape[0]

    Hp = _round_up(H, LANE)          # lane-aligned hidden width (per gate)
    Dp = _round_up(D, LANE)          # lane-dense FC output
    B_BLK, Bp = _pick_batch_block(B)

    mm_bytes = jnp.dtype(matmul_dtype).itemsize
    budget = _vmem_budget_bytes()
    t_tile = _pick_t_tile(t_tile, T, B_BLK, I, Hp, Dp, mm_bytes, budget)
    Tp = _round_up(T, t_tile)

    f32 = jnp.float32

    # ---- gate-aware padding (PyTorch gate order r|z|n stays 128-lane aligned) ----
    def pad_gated_weight(w, in_dim, in_pad):
        # w: (3H, in_dim) -> (in_pad, 3*Hp); each gate block padded independently.
        w3 = w.reshape(3, H, in_dim)
        w3 = jnp.pad(w3, ((0, 0), (0, Hp - H), (0, in_pad - in_dim)))
        return jnp.transpose(w3, (2, 0, 1)).reshape(in_pad, 3 * Hp)

    wih_t = pad_gated_weight(w_ih, I, I).astype(matmul_dtype)       # (I, 3Hp)
    whh_t = pad_gated_weight(w_hh, H, Hp).astype(matmul_dtype)      # (Hp, 3Hp)

    bih3 = jnp.pad(b_ih.reshape(3, H), ((0, 0), (0, Hp - H)))
    bhh3 = jnp.pad(b_hh.reshape(3, H), ((0, 0), (0, Hp - H)))
    # Fold b_hh into the hoisted projection for r/z; n keeps b_hh separate
    # (it must be applied before the r-mask, like PyTorch).
    b_comb = jnp.stack([bih3[0] + bhh3[0], bih3[1] + bhh3[1], bih3[2]])
    b_comb = b_comb.reshape(1, 3 * Hp).astype(f32)
    bhh_n = bhh3[2].reshape(1, Hp).astype(f32)

    wfc_t = jnp.pad(w_fc, ((0, Dp - D), (0, Hp - H))).T.astype(matmul_dtype)  # (Hp, Dp)
    bfc2 = jnp.pad(b_fc, (0, Dp - D)).reshape(1, Dp).astype(f32)

    # Time-major, padded input (padded lanes/rows are zero -> provably no leak).
    # TODO(synk): the (1,0,2) layout transposes stay wrapper-side (batch-first
    # blocks would need strided per-step VMEM access or in-kernel relayouts).
    x_tm = jnp.transpose(x, (1, 0, 2)).astype(matmul_dtype)
    x_tm = jnp.pad(x_tm, ((0, Tp - T), (0, Bp - B), (0, 0)))        # (Tp, Bp, I)

    grid = (Bp // B_BLK, Tp // t_tile)                              # (parallel, arbitrary)
    unroll = True if t_tile <= 16 else 8

    grid_spec = pltpu.PrefetchScalarGridSpec(
        num_scalar_prefetch=0,
        grid=grid,
        in_specs=[
            pl.BlockSpec((t_tile, B_BLK, I), lambda b, t: (t, b, 0)),   # streamed x
            pl.BlockSpec((I, 3 * Hp), lambda b, t: (0, 0)),             # weights stay
            pl.BlockSpec((Hp, 3 * Hp), lambda b, t: (0, 0)),            # resident
            pl.BlockSpec((1, 3 * Hp), lambda b, t: (0, 0)),
            pl.BlockSpec((1, Hp), lambda b, t: (0, 0)),
            pl.BlockSpec((Hp, Dp), lambda b, t: (0, 0)),
            pl.BlockSpec((1, Dp), lambda b, t: (0, 0)),
        ],
        out_specs=pl.BlockSpec((t_tile, B_BLK, Dp), lambda b, t: (t, b, 0)),
        scratch_shapes=[
            pltpu.VMEM((B_BLK, Hp), f32),                 # h carried across time-tiles
            pltpu.VMEM((t_tile * B_BLK, 3 * Hp), f32),    # hoisted input projection
            pltpu.VMEM((t_tile * B_BLK, Hp), f32),        # hidden-state history
        ],
    )

    out_tm = pl.pallas_call(
        functools.partial(_gru_fc_kernel, hp=Hp, t_tile=t_tile,
                          b_blk=B_BLK, unroll=unroll),
        out_shape=jax.ShapeDtypeStruct((Tp, Bp, Dp), f32),
        grid_spec=grid_spec,
        compiler_params=pltpu.CompilerParams(
            dimension_semantics=("parallel", "arbitrary"),
            vmem_limit_bytes=int(budget),
        ),
    )(x_tm, wih_t, whh_t, b_comb, bhh_n, wfc_t, bfc2)

    out = out_tm[:T, :B, :D]                              # strip padding
    return jnp.transpose(out, (1, 0, 2))                  # (B, T, D)


def init_params(key, input_size, hidden_units, dense_units):
    """Deterministic init matching the PyTorch parameter shapes."""
    ks = jax.random.split(key, 6)
    s = 1.0 / jnp.sqrt(hidden_units)
    u = lambda k, shape: jax.random.uniform(k, shape, jnp.float32, -s, s)
    return {
        "w_ih": u(ks[0], (3 * hidden_units, input_size)),   # weight_ih_l0
        "w_hh": u(ks[1], (3 * hidden_units, hidden_units)), # weight_hh_l0
        "b_ih": u(ks[2], (3 * hidden_units,)),              # bias_ih_l0
        "b_hh": u(ks[3], (3 * hidden_units,)),              # bias_hh_l0
        "w_fc": u(ks[4], (dense_units, hidden_units)),      # fc.weight
        "b_fc": u(ks[5], (dense_units,)),                   # fc.bias
    }


def gru_model_reference(x, params):
    """Pure-JAX reference of the PyTorch forward, for correctness check."""
    w_ih, w_hh, b_ih, b_hh = (params["w_ih"], params["w_hh"],
                              params["b_ih"], params["b_hh"])
    H = w_hh.shape[1]
    B, T, _ = x.shape

    def step(h, x_t):
        gi = x_t @ w_ih.T + b_ih
        gh = h @ w_hh.T + b_hh
        r = jax.nn.sigmoid(gi[:, :H] + gh[:, :H])
        z = jax.nn.sigmoid(gi[:, H:2 * H] + gh[:, H:2 * H])
        n = jnp.tanh(gi[:, 2 * H:] + r * gh[:, 2 * H:])
        h_new = (1.0 - z) * n + z * h
        return h_new, h_new

    h0 = jnp.zeros((B, H), jnp.float32)
    _, hs = lax.scan(step, h0, jnp.transpose(x, (1, 0, 2)))      # (T, B, H)
    gru_out = jnp.transpose(hs, (1, 0, 2))                       # (B, T, H)
    return gru_out @ params["w_fc"].T + params["b_fc"]


if __name__ == "__main__":
    root = jax.random.PRNGKey(0)
    k1, k2 = jax.random.split(root)

    # Config 1: the module's small shapes; f32 matmuls for a tight tolerance;
    # t_tile=4 so the time grid has 2 sequential steps (exercises the h-carry
    # across time-tiles).
    batch, seq, input_size, hidden_units, dense_units = 2, 8, 16, 32, 8
    k_x, k_p = jax.random.split(k1)
    x = jax.random.normal(k_x, (batch, seq, input_size), jnp.float32)
    params = init_params(k_p, input_size, hidden_units, dense_units)

    out = jax.block_until_ready(
        gru_model_forward(x, params, t_tile=4, matmul_dtype=jnp.float32))
    ref = gru_model_reference(x, params)
    assert out.shape == (batch, seq, dense_units), out.shape
    err = float(jnp.max(jnp.abs(out - ref)))
    assert err < 2e-3, err

    # Config 2: ragged batch/time (exercises padding paths) + default bf16 MXU
    # operands (f32 accumulation / gate math), as recommended for v6e/v7x.
    batch2, seq2 = 3, 10
    k_x2, k_p2 = jax.random.split(k2)
    x2 = jax.random.normal(k_x2, (batch2, seq2, input_size), jnp.float32)
    params2 = init_params(k_p2, input_size, hidden_units, dense_units)
    out2 = jax.block_until_ready(gru_model_forward(x2, params2, t_tile=4))
    ref2 = gru_model_reference(x2, params2)
    assert out2.shape == (batch2, seq2, dense_units), out2.shape
    err2 = float(jnp.max(jnp.abs(out2 - ref2)))
    assert err2 < 5e-2, err2

    print("KERNEL_OK")
</pallas_src>

<mosaic_0001>
module attributes {stable_mosaic.version = 11 : i64} {
  func.func @_gru_fc_kernel(%arg0: i32, %arg1: i32, %arg2: memref<4x8x16xf32, #tpu.memory_space<vmem>>, %arg3: memref<16x384xf32, #tpu.memory_space<vmem>>, %arg4: memref<128x384xf32, #tpu.memory_space<vmem>>, %arg5: memref<1x384xf32, #tpu.memory_space<vmem>>, %arg6: memref<1x128xf32, #tpu.memory_space<vmem>>, %arg7: memref<128x128xf32, #tpu.memory_space<vmem>>, %arg8: memref<1x128xf32, #tpu.memory_space<vmem>>, %arg9: memref<4x8x128xf32, #tpu.memory_space<vmem>>, %arg10: memref<8x128xf32, #tpu.memory_space<vmem>>, %arg11: memref<32x384xf32, #tpu.memory_space<vmem>>, %arg12: memref<32x128xf32, #tpu.memory_space<vmem>>) attributes {dimension_semantics = [#tpu.dimension_semantics<parallel>, #tpu.dimension_semantics<arbitrary>], iteration_bounds = array<i64: 1, 2>, scalar_prefetch = 0 : i64, scratch_operands = 3 : i64, tpu.core_type = #tpu.core_type<tc>, window_params = [{transform_indices = @transform_0, window_bounds = array<i64: 4, 8, 16>}, {pipeline_mode = #tpu.pipeline_mode<synchronous>, transform_indices = @transform_1, window_bounds = array<i64: 16, 384>}, {pipeline_mode = #tpu.pipeline_mode<synchronous>, transform_indices = @transform_2, window_bounds = array<i64: 128, 384>}, {pipeline_mode = #tpu.pipeline_mode<synchronous>, transform_indices = @transform_3, window_bounds = array<i64: 1, 384>}, {pipeline_mode = #tpu.pipeline_mode<synchronous>, transform_indices = @transform_4, window_bounds = array<i64: 1, 128>}, {pipeline_mode = #tpu.pipeline_mode<synchronous>, transform_indices = @transform_5, window_bounds = array<i64: 128, 128>}, {pipeline_mode = #tpu.pipeline_mode<synchronous>, transform_indices = @transform_6, window_bounds = array<i64: 1, 128>}, {transform_indices = @transform_7, window_bounds = array<i64: 4, 8, 128>}]} {
    %c0_i32 = arith.constant 0 : i32
    %0 = arith.cmpi eq, %arg1, %c0_i32 : i32
    %1 = arith.extui %0 : i1 to i32
    %c0_i32_0 = arith.constant 0 : i32
    %2 = arith.cmpi ne, %1, %c0_i32_0 : i32
    scf.if %2 {
      %cst_51 = arith.constant 0.000000e+00 : f32
      %153 = vector.broadcast %cst_51 : f32 to vector<8x128xf32>
      %c0_52 = arith.constant 0 : index
      %c0_53 = arith.constant 0 : index
      %154 = vector.load %arg10[%c0_52, %c0_53] : memref<8x128xf32, #tpu.memory_space<vmem>>, vector<8x128xf32>
      tpu.vector_store %arg10[%c0_52, %c0_53], %153 {strides = array<i32>} : memref<8x128xf32, #tpu.memory_space<vmem>>, vector<8x128xf32>,
    } else {
    }
    %c0 = arith.constant 0 : index
    %c0_1 = arith.constant 0 : index
    %c0_2 = arith.constant 0 : index
    %3 = vector.load %arg2[%c0, %c0_1, %c0_2] : memref<4x8x16xf32, #tpu.memory_space<vmem>>, vector<4x8x16xf32>
    %4 = vector.shape_cast %3 : vector<4x8x16xf32> to vector<32x16xf32>
    %c0_3 = arith.constant 0 : index
    %c0_4 = arith.constant 0 : index
    %5 = vector.load %arg3[%c0_3, %c0_4] : memref<16x384xf32, #tpu.memory_space<vmem>>, vector<16x384xf32>
    %cst = arith.constant dense<0.000000e+00> : vector<32x384xf32>
    %6 = tpu.matmul %4, %5, %cst {dimension_numbers = #tpu.dot_dimension_numbers<[1], [0], [0], [1], [0, 0, 1, 1], [], []>} : vector<32x16xf32>, vector<16x384xf32>, vector<32x384xf32> -> vector<32x384xf32>
    %c0_5 = arith.constant 0 : index
    %c0_6 = arith.constant 0 : index
    %7 = vector.load %arg5[%c0_5, %c0_6] : memref<1x384xf32, #tpu.memory_space<vmem>>, vector<1x384xf32>
    %8 = vector.broadcast %7 : vector<1x384xf32> to vector<32x384xf32>
    %9 = arith.addf %6, %8 : vector<32x384xf32>
    %c0_7 = arith.constant 0 : index
    %c0_8 = arith.constant 0 : index
    %10 = vector.load %arg11[%c0_7, %c0_8] : memref<32x384xf32, #tpu.memory_space<vmem>>, vector<32x384xf32>
    tpu.vector_store %arg11[%c0_7, %c0_8], %9 {strides = array<i32>} : memref<32x384xf32, #tpu.memory_space<vmem>>, vector<32x384xf32>,
    %c0_9 = arith.constant 0 : index
    %c0_10 = arith.constant 0 : index
    %11 = vector.load %arg4[%c0_9, %c0_10] : memref<128x384xf32, #tpu.memory_space<vmem>>, vector<128x384xf32>
    %c0_11 = arith.constant 0 : index
    %c0_12 = arith.constant 0 : index
    %12 = vector.load %arg6[%c0_11, %c0_12] : memref<1x128xf32, #tpu.memory_space<vmem>>, vector<1x128xf32>
    %13 = vector.shape_cast %12 : vector<1x128xf32> to vector<1x128xf32>
    %14 = vector.broadcast %13 : vector<1x128xf32> to vector<8x128xf32>
    %c0_13 = arith.constant 0 : index
    %c0_14 = arith.constant 0 : index
    %15 = vector.load %arg10[%c0_13, %c0_14] : memref<8x128xf32, #tpu.memory_space<vmem>>, vector<8x128xf32>
    %c0_i32_15 = arith.constant 0 : i32
    %c8_i32 = arith.constant 8 : i32
    %16 = arith.muli %c0_i32_15, %c8_i32 : i32
    %17 = tpu.assume_multiple %16, 8 : i32
    %18 = arith.index_cast %17 : i32 to index
    %c0_16 = arith.constant 0 : index
    %19 = vector.load %arg11[%18, %c0_16] : memref<32x384xf32, #tpu.memory_space<vmem>>, vector<8x384xf32>
    %cst_17 = arith.constant dense<0.000000e+00> : vector<8x384xf32>
    %20 = tpu.matmul %15, %11, %cst_17 {dimension_numbers = #tpu.dot_dimension_numbers<[1], [0], [0], [1], [0, 0, 1, 1], [], []>} : vector<8x128xf32>, vector<128x384xf32>, vector<8x384xf32> -> vector<8x384xf32>
    %21 = vector.extract_strided_slice %19 {offsets = [0, 0], sizes = [8, 128], strides = [1, 1]} : vector<8x384xf32> to vector<8x128xf32>
    %22 = vector.extract_strided_slice %20 {offsets = [0, 0], sizes = [8, 128], strides = [1, 1]} : vector<8x384xf32> to vector<8x128xf32>
    %23 = arith.addf %21, %22 : vector<8x128xf32>
    %24 = arith.negf %23 : vector<8x128xf32>
    %25 = math.exp %24 : vector<8x128xf32>
    %cst_18 = arith.constant 1.000000e+00 : f32
    %26 = vector.broadcast %cst_18 : f32 to vector<8x128xf32>
    %27 = arith.addf %26, %25 : vector<8x128xf32>
    %28 = arith.divf %26, %27 : vector<8x128xf32>
    %29 = vector.extract_strided_slice %19 {offsets = [0, 128], sizes = [8, 128], strides = [1, 1]} : vector<8x384xf32> to vector<8x128xf32>
    %30 = vector.extract_strided_slice %20 {offsets = [0, 128], sizes = [8, 128], strides = [1, 1]} : vector<8x384xf32> to vector<8x128xf32>
    %31 = arith.addf %29, %30 : vector<8x128xf32>
    %32 = arith.negf %31 : vector<8x128xf32>
    %33 = math.exp %32 : vector<8x128xf32>
    %cst_19 = arith.constant 1.000000e+00 : f32
    %34 = vector.broadcast %cst_19 : f32 to vector<8x128xf32>
    %35 = arith.addf %34, %33 : vector<8x128xf32>
    %36 = arith.divf %34, %35 : vector<8x128xf32>
    %37 = vector.extract_strided_slice %19 {offsets = [0, 256], sizes = [8, 128], strides = [1, 1]} : vector<8x384xf32> to vector<8x128xf32>
    %38 = vector.extract_strided_slice %20 {offsets = [0, 256], sizes = [8, 128], strides = [1, 1]} : vector<8x384xf32> to vector<8x128xf32>
    %39 = arith.addf %38, %14 : vector<8x128xf32>
    %40 = arith.mulf %28, %39 : vector<8x128xf32>
    %41 = arith.addf %37, %40 : vector<8x128xf32>
    %42 = math.tanh %41 : vector<8x128xf32>
    %43 = arith.subf %15, %42 : vector<8x128xf32>
    %44 = arith.mulf %36, %43 : vector<8x128xf32>
    %45 = arith.addf %42, %44 : vector<8x128xf32>
    %46 = arith.index_cast %17 : i32 to index
    %c0_20 = arith.constant 0 : index
    %47 = vector.load %arg12[%46, %c0_20] : memref<32x128xf32, #tpu.memory_space<vmem>>, vector<8x128xf32>
    tpu.vector_store %arg12[%46, %c0_20], %45 {strides = array<i32>} : memref<32x128xf32, #tpu.memory_space<vmem>>, vector<8x128xf32>,
    %c1_i32 = arith.constant 1 : i32
    %c8_i32_21 = arith.constant 8 : i32
    %48 = arith.muli %c1_i32, %c8_i32_21 : i32
    %49 = tpu.assume_multiple %48, 8 : i32
    %50 = arith.index_cast %49 : i32 to index
    %c0_22 = arith.constant 0 : index
    %51 = vector.load %arg11[%50, %c0_22] : memref<32x384xf32, #tpu.memory_space<vmem>>, vector<8x384xf32>
    %cst_23 = arith.constant dense<0.000000e+00> : vector<8x384xf32>
    %52 = tpu.matmul %45, %11, %cst_23 {dimension_numbers = #tpu.dot_dimension_numbers<[1], [0], [0], [1], [0, 0, 1, 1], [], []>} : vector<8x128xf32>, vector<128x384xf32>, vector<8x384xf32> -> vector<8x384xf32>
    %53 = vector.extract_strided_slice %51 {offsets = [0, 0], sizes = [8, 128], strides = [1, 1]} : vector<8x384xf32> to vector<8x128xf32>
    %54 = vector.extract_strided_slice %52 {offsets = [0, 0], sizes = [8, 128], strides = [1, 1]} : vector<8x384xf32> to vector<8x128xf32>
    %55 = arith.addf %53, %54 : vector<8x128xf32>
    %56 = arith.negf %55 : vector<8x128xf32>
    %57 = math.exp %56 : vector<8x128xf32>
    %cst_24 = arith.constant 1.000000e+00 : f32
    %58 = vector.broadcast %cst_24 : f32 to vector<8x128xf32>
    %59 = arith.addf %58, %57 : vector<8x128xf32>
    %60 = arith.divf %58, %59 : vector<8x128xf32>
    %61 = vector.extract_strided_slice %51 {offsets = [0, 128], sizes = [8, 128], strides = [1, 1]} : vector<8x384xf32> to vector<8x128xf32>
    %62 = vector.extract_strided_slice %52 {offsets = [0, 128], sizes = [8, 128], strides = [1, 1]} : vector<8x384xf32> to vector<8x128xf32>
    %63 = arith.addf %61, %62 : vector<8x128xf32>
    %64 = arith.negf %63 : vector<8x128xf32>
    %65 = math.exp %64 : vector<8x128xf32>
    %cst_25 = arith.constant 1.000000e+00 : f32
    %66 = vector.broadcast %cst_25 : f32 to vector<8x128xf32>
    %67 = arith.addf %66, %65 : vector<8x128xf32>
    %68 = arith.divf %66, %67 : vector<8x128xf32>
    %69 = vector.extract_strided_slice %51 {offsets = [0, 256], sizes = [8, 128], strides = [1, 1]} : vector<8x384xf32> to vector<8x128xf32>
    %70 = vector.extract_strided_slice %52 {offsets = [0, 256], sizes = [8, 128], strides = [1, 1]} : vector<8x384xf32> to vector<8x128xf32>
    %71 = arith.addf %70, %14 : vector<8x128xf32>
    %72 = arith.mulf %60, %71 : vector<8x128xf32>
    %73 = arith.addf %69, %72 : vector<8x128xf32>
    %74 = math.tanh %73 : vector<8x128xf32>
    %75 = arith.subf %45, %74 : vector<8x128xf32>
    %76 = arith.mulf %68, %75 : vector<8x128xf32>
    %77 = arith.addf %74, %76 : vector<8x128xf32>
    %78 = arith.index_cast %49 : i32 to index
    %c0_26 = arith.constant 0 : index
    %79 = vector.load %arg12[%78, %c0_26] : memref<32x128xf32, #tpu.memory_space<vmem>>, vector<8x128xf32>
    tpu.vector_store %arg12[%78, %c0_26], %77 {strides = array<i32>} : memref<32x128xf32, #tpu.memory_space<vmem>>, vector<8x128xf32>,
    %c2_i32 = arith.constant 2 : i32
    %c8_i32_27 = arith.constant 8 : i32
    %80 = arith.muli %c2_i32, %c8_i32_27 : i32
    %81 = tpu.assume_multiple %80, 8 : i32
    %82 = arith.index_cast %81 : i32 to index
    %c0_28 = arith.constant 0 : index
    %83 = vector.load %arg11[%82, %c0_28] : memref<32x384xf32, #tpu.memory_space<vmem>>, vector<8x384xf32>
    %cst_29 = arith.constant dense<0.000000e+00> : vector<8x384xf32>
    %84 = tpu.matmul %77, %11, %cst_29 {dimension_numbers = #tpu.dot_dimension_numbers<[1], [0], [0], [1], [0, 0, 1, 1], [], []>} : vector<8x128xf32>, vector<128x384xf32>, vector<8x384xf32> -> vector<8x384xf32>
    %85 = vector.extract_strided_slice %83 {offsets = [0, 0], sizes = [8, 128], strides = [1, 1]} : vector<8x384xf32> to vector<8x128xf32>
    %86 = vector.extract_strided_slice %84 {offsets = [0, 0], sizes = [8, 128], strides = [1, 1]} : vector<8x384xf32> to vector<8x128xf32>
    %87 = arith.addf %85, %86 : vector<8x128xf32>
    %88 = arith.negf %87 : vector<8x128xf32>
    %89 = math.exp %88 : vector<8x128xf32>
    %cst_30 = arith.constant 1.000000e+00 : f32
    %90 = vector.broadcast %cst_30 : f32 to vector<8x128xf32>
    %91 = arith.addf %90, %89 : vector<8x128xf32>
    %92 = arith.divf %90, %91 : vector<8x128xf32>
    %93 = vector.extract_strided_slice %83 {offsets = [0, 128], sizes = [8, 128], strides = [1, 1]} : vector<8x384xf32> to vector<8x128xf32>
    %94 = vector.extract_strided_slice %84 {offsets = [0, 128], sizes = [8, 128], strides = [1, 1]} : vector<8x384xf32> to vector<8x128xf32>
    %95 = arith.addf %93, %94 : vector<8x128xf32>
    %96 = arith.negf %95 : vector<8x128xf32>
    %97 = math.exp %96 : vector<8x128xf32>
    %cst_31 = arith.constant 1.000000e+00 : f32
    %98 = vector.broadcast %cst_31 : f32 to vector<8x128xf32>
    %99 = arith.addf %98, %97 : vector<8x128xf32>
    %100 = arith.divf %98, %99 : vector<8x128xf32>
    %101 = vector.extract_strided_slice %83 {offsets = [0, 256], sizes = [8, 128], strides = [1, 1]} : vector<8x384xf32> to vector<8x128xf32>
    %102 = vector.extract_strided_slice %84 {offsets = [0, 256], sizes = [8, 128], strides = [1, 1]} : vector<8x384xf32> to vector<8x128xf32>
    %103 = arith.addf %102, %14 : vector<8x128xf32>
    %104 = arith.mulf %92, %103 : vector<8x128xf32>
    %105 = arith.addf %101, %104 : vector<8x128xf32>
    %106 = math.tanh %105 : vector<8x128xf32>
    %107 = arith.subf %77, %106 : vector<8x128xf32>
    %108 = arith.mulf %100, %107 : vector<8x128xf32>
    %109 = arith.addf %106, %108 : vector<8x128xf32>
    %110 = arith.index_cast %81 : i32 to index
    %c0_32 = arith.constant 0 : index
    %111 = vector.load %arg12[%110, %c0_32] : memref<32x128xf32, #tpu.memory_space<vmem>>, vector<8x128xf32>
    tpu.vector_store %arg12[%110, %c0_32], %109 {strides = array<i32>} : memref<32x128xf32, #tpu.memory_space<vmem>>, vector<8x128xf32>,
    %c3_i32 = arith.constant 3 : i32
    %c8_i32_33 = arith.constant 8 : i32
    %112 = arith.muli %c3_i32, %c8_i32_33 : i32
    %113 = tpu.assume_multiple %112, 8 : i32
    %114 = arith.index_cast %113 : i32 to index
    %c0_34 = arith.constant 0 : index
    %115 = vector.load %arg11[%114, %c0_34] : memref<32x384xf32, #tpu.memory_space<vmem>>, vector<8x384xf32>
    %cst_35 = arith.constant dense<0.000000e+00> : vector<8x384xf32>
    %116 = tpu.matmul %109, %11, %cst_35 {dimension_numbers = #tpu.dot_dimension_numbers<[1], [0], [0], [1], [0, 0, 1, 1], [], []>} : vector<8x128xf32>, vector<128x384xf32>, vector<8x384xf32> -> vector<8x384xf32>
    %117 = vector.extract_strided_slice %115 {offsets = [0, 0], sizes = [8, 128], strides = [1, 1]} : vector<8x384xf32> to vector<8x128xf32>
    %118 = vector.extract_strided_slice %116 {offsets = [0, 0], sizes = [8, 128], strides = [1, 1]} : vector<8x384xf32> to vector<8x128xf32>
    %119 = arith.addf %117, %118 : vector<8x128xf32>
    %120 = arith.negf %119 : vector<8x128xf32>
    %121 = math.exp %120 : vector<8x128xf32>
    %cst_36 = arith.constant 1.000000e+00 : f32
    %122 = vector.broadcast %cst_36 : f32 to vector<8x128xf32>
    %123 = arith.addf %122, %121 : vector<8x128xf32>
    %124 = arith.divf %122, %123 : vector<8x128xf32>
    %125 = vector.extract_strided_slice %115 {offsets = [0, 128], sizes = [8, 128], strides = [1, 1]} : vector<8x384xf32> to vector<8x128xf32>
    %126 = vector.extract_strided_slice %116 {offsets = [0, 128], sizes = [8, 128], strides = [1, 1]} : vector<8x384xf32> to vector<8x128xf32>
    %127 = arith.addf %125, %126 : vector<8x128xf32>
    %128 = arith.negf %127 : vector<8x128xf32>
    %129 = math.exp %128 : vector<8x128xf32>
    %cst_37 = arith.constant 1.000000e+00 : f32
    %130 = vector.broadcast %cst_37 : f32 to vector<8x128xf32>
    %131 = arith.addf %130, %129 : vector<8x128xf32>
    %132 = arith.divf %130, %131 : vector<8x128xf32>
    %133 = vector.extract_strided_slice %115 {offsets = [0, 256], sizes = [8, 128], strides = [1, 1]} : vector<8x384xf32> to vector<8x128xf32>
    %134 = vector.extract_strided_slice %116 {offsets = [0, 256], sizes = [8, 128], strides = [1, 1]} : vector<8x384xf32> to vector<8x128xf32>
    %135 = arith.addf %134, %14 : vector<8x128xf32>
    %136 = arith.mulf %124, %135 : vector<8x128xf32>
    %137 = arith.addf %133, %136 : vector<8x128xf32>
    %138 = math.tanh %137 : vector<8x128xf32>
    %139 = arith.subf %109, %138 : vector<8x128xf32>
    %140 = arith.mulf %132, %139 : vector<8x128xf32>
    %141 = arith.addf %138, %140 : vector<8x128xf32>
    %142 = arith.index_cast %113 : i32 to index
    %c0_38 = arith.constant 0 : index
    %143 = vector.load %arg12[%142, %c0_38] : memref<32x128xf32, #tpu.memory_space<vmem>>, vector<8x128xf32>
    tpu.vector_store %arg12[%142, %c0_38], %141 {strides = array<i32>} : memref<32x128xf32, #tpu.memory_space<vmem>>, vector<8x128xf32>,
    %c4_i32 = arith.constant 4 : i32
    %c0_39 = arith.constant 0 : index
    %c0_40 = arith.constant 0 : index
    %144 = vector.load %arg10[%c0_39, %c0_40] : memref<8x128xf32, #tpu.memory_space<vmem>>, vector<8x128xf32>
    tpu.vector_store %arg10[%c0_39, %c0_40], %141 {strides = array<i32>} : memref<8x128xf32, #tpu.memory_space<vmem>>, vector<8x128xf32>,
    %c0_41 = arith.constant 0 : index
    %c0_42 = arith.constant 0 : index
    %145 = vector.load %arg12[%c0_41, %c0_42] : memref<32x128xf32, #tpu.memory_space<vmem>>, vector<32x128xf32>
    %c0_43 = arith.constant 0 : index
    %c0_44 = arith.constant 0 : index
    %146 = vector.load %arg7[%c0_43, %c0_44] : memref<128x128xf32, #tpu.memory_space<vmem>>, vector<128x128xf32>
    %cst_45 = arith.constant dense<0.000000e+00> : vector<32x128xf32>
    %147 = tpu.matmul %145, %146, %cst_45 {dimension_numbers = #tpu.dot_dimension_numbers<[1], [0], [0], [1], [0, 0, 1, 1], [], []>} : vector<32x128xf32>, vector<128x128xf32>, vector<32x128xf32> -> vector<32x128xf32>
    %c0_46 = arith.constant 0 : index
    %c0_47 = arith.constant 0 : index
    %148 = vector.load %arg8[%c0_46, %c0_47] : memref<1x128xf32, #tpu.memory_space<vmem>>, vector<1x128xf32>
    %149 = vector.broadcast %148 : vector<1x128xf32> to vector<32x128xf32>
    %150 = arith.addf %147, %149 : vector<32x128xf32>
    %151 = vector.shape_cast %150 : vector<32x128xf32> to vector<4x8x128xf32>
    %c0_48 = arith.constant 0 : index
    %c0_49 = arith.constant 0 : index
    %c0_50 = arith.constant 0 : index
    %152 = vector.load %arg9[%c0_48, %c0_49, %c0_50] : memref<4x8x128xf32, #tpu.memory_space<vmem>>, vector<4x8x128xf32>
    tpu.vector_store %arg9[%c0_48, %c0_49, %c0_50], %151 {strides = array<i32>} : memref<4x8x128xf32, #tpu.memory_space<vmem>>, vector<4x8x128xf32>,
    return
  }
  func.func @transform_0(%arg0: i32, %arg1: i32) -> (i32, i32, i32) {
    %c0_i32 = arith.constant 0 : i32
    %c0_i32_0 = arith.constant 0 : i32
    return %arg1, %arg0, %c0_i32 : i32, i32, i32
  }
  func.func @transform_1(%arg0: i32, %arg1: i32) -> (i32, i32) {
    %c0_i32 = arith.constant 0 : i32
    %c0_i32_0 = arith.constant 0 : i32
    %c0_i32_1 = arith.constant 0 : i32
    return %c0_i32, %c0_i32_0 : i32, i32
  }
  func.func @transform_2(%arg0: i32, %arg1: i32) -> (i32, i32) {
    %c0_i32 = arith.constant 0 : i32
    %c0_i32_0 = arith.constant 0 : i32
    %c0_i32_1 = arith.constant 0 : i32
    return %c0_i32, %c0_i32_0 : i32, i32
  }
  func.func @transform_3(%arg0: i32, %arg1: i32) -> (i32, i32) {
    %c0_i32 = arith.constant 0 : i32
    %c0_i32_0 = arith.constant 0 : i32
    %c0_i32_1 = arith.constant 0 : i32
    return %c0_i32, %c0_i32_0 : i32, i32
  }
  func.func @transform_4(%arg0: i32, %arg1: i32) -> (i32, i32) {
    %c0_i32 = arith.constant 0 : i32
    %c0_i32_0 = arith.constant 0 : i32
    %c0_i32_1 = arith.constant 0 : i32
    return %c0_i32, %c0_i32_0 : i32, i32
  }
  func.func @transform_5(%arg0: i32, %arg1: i32) -> (i32, i32) {
    %c0_i32 = arith.constant 0 : i32
    %c0_i32_0 = arith.constant 0 : i32
    %c0_i32_1 = arith.constant 0 : i32
    return %c0_i32, %c0_i32_0 : i32, i32
  }
  func.func @transform_6(%arg0: i32, %arg1: i32) -> (i32, i32) {
    %c0_i32 = arith.constant 0 : i32
    %c0_i32_0 = arith.constant 0 : i32
    %c0_i32_1 = arith.constant 0 : i32
    return %c0_i32, %c0_i32_0 : i32, i32
  }
  func.func @transform_7(%arg0: i32, %arg1: i32) -> (i32, i32, i32) {
    %c0_i32 = arith.constant 0 : i32
    %c0_i32_0 = arith.constant 0 : i32
    return %arg1, %arg0, %c0_i32 : i32, i32, i32
  }
}

</mosaic_0001>

<bundles_post_ra>
// kernel: tpu_custom_call.1
= control target key start
LH: loop header
LB: loop body
LE: loop exit
PB: predicated region body
PF: predicated region fallthrough
CT: control target
= control target key end

     0   :  { %s3148_s0 = inlined_call_operand.hbm [shape: f32[8,8,16], index: 0, kind: input, shape index: {}]   ;;  %s3149_s1 = inlined_call_operand.hbm [shape: f32[16,384], index: 1, kind: input, shape index: {}]   ;;  %s3150_s2 = inlined_call_operand.hbm [shape: f32[128,384], index: 2, kind: input, shape index: {}]   ;;  %s3151_s3 = inlined_call_operand.vmem [shape: f32[1,384], index: 3, kind: input, shape index: {}]   ;;  %s3152_s4 = inlined_call_operand.vmem [shape: f32[1,128], index: 4, kind: input, shape index: {}]   ;;  %s3153_s5 = inlined_call_operand.hbm [shape: f32[128,128], index: 5, kind: input, shape index: {}]   ;;  %s3154_s6 = inlined_call_operand.vmem [shape: f32[1,128], index: 6, kind: input, shape index: {}]   ;;  %s3155_s7 = inlined_call_operand.hbm [shape: f32[8,8,128], index: 7, kind: output, shape index: {}]  }
   0x1   :  { %3163 = sst [smem:[#allocation20_spill]] %s3154_s6 }
   0x2   :  { %3164 = sst [smem:[#allocation21_spill]] %s3155_s7 }
   0x3   :  { %12 = vsyncpa [#allocation6], 0 }
   0x4   :  { %14 = vsyncpa [#allocation6 + $0x1], 0 }
   0x5   :  { %15 = vsyncpa [#allocation9], 0 }
   0x6   :  { %16 = vsyncpa [#allocation12], 0 }
   0x7   :  { %17 = vsyncpa [#allocation7], 0 }
   0x8   :  { %19 = vsyncpa [#allocation7 + $0x1], 0  ;;  %s2583_s24 = smov 0   ;;  %s2585_s25 = smov 0  }
   0x9   :  { %s2587_s26 = smov 0   ;;  %s2589_s27 = smov 0  }
   0xa   :  { %s2591_s28 = smov 0   ;;  %s2593_s29 = smov 0  }
   0xb LB: > { %3165 = sst [smem:[#allocation18_spill]] %s2506_s24  ;;  %s1575_s30 = sadd.s32 4294967295, %s2526_s29   ;;  %s2526_s29 = sphi %s2593_s29, %s25_s29   ;;  %s2522_s28 = sphi %s2591_s28, %s3190_s28   ;;  %s2518_s27 = sphi %s2589_s27, %s3189_s27   ;;  %s2514_s26 = sphi %s2587_s26, %s3188_s26   ;;  %s2510_s25 = sphi %s2585_s25, %s3187_s25   ;;  %s2506_s24 = sphi %s2583_s24, %s3186_s24  }
   0xc   : > { %s1576_s8 = sadd.s32 4294967294, %s2526_s29   ;;  %p59_p0 = scmp.ne.s32.totalorder %s2510_s25, %s2506_s24 }
   0xd   : > { %p2617_p1 = scmp.eq.s32.totalorder %s1575_s30, 0  ;;  %p2621_p2 = scmp.eq.s32.totalorder %s1575_s30, 1 }
   0xe   : > { %p217_p3 = scmp.eq.s32.totalorder %s1576_s8, 1  ;;  %p1577_p5 = scmp.ge.s32.totalorder %s2526_s29, 1 }
   0xf   : > { %s3166_s9 = scalar_select %p2617_p1, 1, 0 }
  0x10   : > { %s3167_s10 = scalar_select %p2621_p2, 1, 0 }
  0x11   : > { %p2627_p4 = por %p2617_p1, %p59_p0  ;;  %p2632_p6 = por %p217_p3, %p59_p0 }
  0x12   : > { %p224_p7 = scmp.lt.s32.totalorder %s2526_s29, 3  ;;  %s2528_s14 = smov [#allocation8]  }
  0x13   : > { %s3168_s11 = scalar_select %p2627_p4, 1, 0 }
  0x14   : > { %s3169_s12 = scalar_select %p2632_p6, 1, 0 }
  0x15   : > { %p2637_p8 = pnand %p1577_p5, %p224_p7  ;;  %s236_s15 = sshll.u32 %s2528_s14, 4  ;;  %s2641_s15 = int_to_ptr.vmem [resolvable:$true] %s236_s15 }
  0x16   : > { %3170 = sst [smem:[#allocation19_spill]] %s3169_s12  ;;  %s2529_s17 = smov [#allocation10]  }
  0x17   : > { %s3171_s13 = scalar_select %p2637_p8, 1, 0 }
  0x18   : > { %p2195_p9 = pneg %p2637_p8  ;;  %s249_s18 = sshll.u32 %s2529_s17, 4  ;;  %s2652_s18 = int_to_ptr.vmem [resolvable:$true] %s249_s18 }
  0x19   : > { %s2530_s19 = smov [#allocation11]   ;;  %s2322_s23 = scalar_lea.hbm %s3149_s1, 768 }
  0x1a   : > { %p2648_p11 = pnand %p2195_p9, %p2617_p1  ;;  %s2654_s20 = sshll.u32 %s2530_s19, 4  ;;  %s269_s20 = int_to_ptr.vmem [resolvable:$true] %s2654_s20 }
  0x1b   : > { %p2323_p12 = scmp.ne.s32.totalorder %s3149_s1, %s2322_s23  ;;  %p2329_p5 = scmp.lt.u32.totalorder %s2322_s23, %s3149_s1 }
  0x1c   : > { %p2664_p13 = pneg %p2648_p11 }
  0x1e   : > { %p2325_p0 = pnand %p2664_p13, %p2323_p12 }
  0x20   : > { %p2326_p3 = pneg %p2325_p0 }
  0x22   : > { %p2331_p7 = pnand %p2329_p5, %p2326_p3 }
  0x24   : > { %2334 = shalt.err (!%p2331_p7)
}
  0x25   : > { %s2335_s21 = scalar_lea.vmem %s2641_s15, 768  ;;  %p2343_p1 = scmp.lt.s32.totalorder %s2641_s15, %s2641_s15 }
  0x26   : > { %p2336_p9 = scmp.ne.s32.totalorder %s2641_s15, %s2335_s21  ;;  %p2344_p4 = scmp.lt.s32.totalorder %s2335_s21, %s2335_s21 }
  0x28   : > { %p2338_p10 = pnand %p2336_p9, %p2664_p13  ;;  %p2345_p12 = por %p2344_p4, %p2343_p1 }
  0x2a   : > { %p2339_p6 = pneg %p2338_p10 }
  0x2c   : > { %p2346_p0 = pnand %p2345_p12, %p2339_p6 }
  0x2e   : > { %2349 = shalt.err (!%p2346_p0)
}
  0x2f   : > { %s2531_s22 = smov 384   ;;  %s2532_s23 = smov 24  }
  0x30   : > { %2198 = dma.hbm_to_vmem [thread:$0]  (!%p2648_p11), %s3149_s1, 768, %s2641_s15, [#allocation9], %s2531_s22, %s2531_s22, %s2532_s23  }
  0x31   : > { %s2350_s12 = scalar_lea.hbm %s3150_s2, 6144 }
  0x32   : > { %p2351_p1 = scmp.ne.s32.totalorder %s3150_s2, %s2350_s12  ;;  %p2357_p10 = scmp.lt.u32.totalorder %s2350_s12, %s3150_s2 }
  0x34   : > { %p2353_p4 = pnand %p2351_p1, %p2664_p13 }
  0x36   : > { %p2354_p6 = pneg %p2353_p4 }
  0x38   : > { %p2359_p3 = pnand %p2357_p10, %p2354_p6 }
  0x3a   : > { %2362 = shalt.err (!%p2359_p3)
}
  0x3b   : > { %s2363_s15 = scalar_lea.vmem %s2652_s18, 6144  ;;  %p2371_p12 = scmp.lt.s32.totalorder %s2652_s18, %s2652_s18 }
  0x3c   : > { %p2364_p5 = scmp.ne.s32.totalorder %s2652_s18, %s2363_s15  ;;  %p2372_p0 = scmp.lt.s32.totalorder %s2363_s15, %s2363_s15 }
  0x3e   : > { %p2366_p7 = pnand %p2364_p5, %p2664_p13  ;;  %p2373_p1 = por %p2372_p0, %p2371_p12 }
  0x40   : > { %p2367_p9 = pneg %p2366_p7 }
  0x42   : > { %p2374_p4 = pnand %p2373_p1, %p2367_p9 }
  0x44   : > { %2377 = shalt.err (!%p2374_p4)
}
  0x45   : > { %2201 = dma.hbm_to_vmem [thread:$0]  (!%p2648_p11), %s3150_s2, 6144, %s2652_s18, [#allocation9], %s2531_s22, %s2531_s22, %s2532_s23  }
  0x46   : > { %s2378_s30 = scalar_lea.hbm %s3153_s5, 2048 }
  0x47   : > { %p2379_p6 = scmp.ne.s32.totalorder %s3153_s5, %s2378_s30  ;;  %p2385_p5 = scmp.lt.u32.totalorder %s2378_s30, %s3153_s5 }
  0x49   : > { %p2381_p10 = pnand %p2379_p6, %p2664_p13 }
  0x4b   : > { %p2382_p3 = pneg %p2381_p10 }
  0x4d   : > { %p2387_p7 = pnand %p2385_p5, %p2382_p3 }
  0x4f   : > { %2390 = shalt.err (!%p2387_p7)
}
  0x50   : > { %s2391_s15 = scalar_lea.vmem %s269_s20, 2048  ;;  %p2399_p1 = scmp.lt.s32.totalorder %s269_s20, %s269_s20 }
  0x51   : > { %p2392_p9 = scmp.ne.s32.totalorder %s269_s20, %s2391_s15  ;;  %p2400_p4 = scmp.lt.s32.totalorder %s2391_s15, %s2391_s15 }
  0x53   : > { %p2394_p12 = pnand %p2392_p9, %p2664_p13  ;;  %p2401_p8 = por %p2400_p4, %p2399_p1 }
  0x55   : > { %p2395_p0 = pneg %p2394_p12 }
  0x57   : > { %p2402_p2 = pnand %p2401_p8, %p2395_p0 }
  0x59   : > { %2405 = shalt.err (!%p2402_p2)
}
  0x5a   : > { %s2533_s18 = smov 128   ;;  %s2534_s14 = smov 8  }
  0x5b   : > { %2204 = dma.hbm_to_vmem [thread:$0]  (!%p2648_p11), %s3153_s5, 2048, %s269_s20, [#allocation12], %s2533_s18, %s2533_s18, %s2534_s14  }
  0x5c   : > { %s46_s6 = sadd.s32 1, %s2514_s26  ;;  %s34_s7 = sadd.s32 1, %s2522_s28 }
  0x5d   : > { %p53_p2 = scmp.ne.s32.totalorder %s2514_s26, %s2510_s25  ;;  %p35_p8 = scmp.ge.s32.totalorder %s34_s7, 2 }
  0x5e   : > { %p54_p13 = scmp.eq.s32.totalorder %s2526_s29, 0  ;;  %p3174_p6 = scmp.ne.s32.totalorder %s3167_s10, 0 }
  0x5f   : > { %p2216_p3 = scmp.lt.s32.totalorder %s2526_s29, 2  ;;  %s3192_s7 = smov (%p35_p8, %s34_s7), 0 }
  0x60   : > { %p2737_p10 = por %p3174_p6, %p53_p2  ;;  %p55_p5 = por %p54_p13, %p53_p2 }
  0x61   : > { %s285_s16 = sand.u32 1, %s2514_s26   ;;  %s41_s12 = ssub.s32 %s2522_s28, %s3192_s7 }
  0x62   : > { %p44_p7 = scmp.eq.s32.totalorder %s41_s12, 0  ;;  %s1582_s20 = sshll.u32 %s285_s16, 5 }
  0x63   : > { %s1615_s30 = sshll.u32 %s2522_s28, 9  ;;  %s289_s21 = scalar_lea.vmem [#allocation5], %s1582_s20 }
  0x64   : > { %s2749_s8 = scalar_select %p44_p7, %s2514_s26, %s46_s6  }
  0x65   : > { %s2754_s10 = scalar_lea.hbm %s3148_s0, %s1615_s30  ;;  %s297_s15 = sshll.u32 %s289_s21, 4  ;;  %s2756_s15 = int_to_ptr.vmem [resolvable:$true] %s297_s15 }
  0x66   : > { %p2760_p11 = pnand %p2216_p3, %p55_p5  ;;  %s2764_s23 = scalar_lea.sflag [#allocation6], %s285_s16 }
  0x67   : > { %s2406_s6 = scalar_lea.hbm %s2754_s10, 512  ;;  %s2411_s30 = scalar_lea.hbm %s3148_s0, 1024 }
  0x68   : > { %p2407_p9 = scmp.ne.s32.totalorder %s2754_s10, %s2406_s6  ;;  %p2408_p12 = pneg %p2760_p11 }
  0x69   : > { %p2412_p4 = scmp.lt.u32.totalorder %s2754_s10, %s3148_s0  ;;  %p2413_p2 = scmp.lt.u32.totalorder %s2411_s30, %s2406_s6 }
  0x6a   : > { %p2409_p0 = pnand %p2408_p12, %p2407_p9  ;;  %p2415_p13 = scmp.lt.u32.totalorder %s2406_s6, %s2754_s10 }
  0x6b   : > { %p2414_p8 = por %p2413_p2, %p2412_p4 }
  0x6c   : > { %p2410_p1 = pneg %p2409_p0 }
  0x6d   : > { %p2416_p6 = por %p2415_p13, %p2414_p8 }
  0x6f   : > { %p2417_p3 = pnand %p2416_p6, %p2410_p1 }
  0x71   : > { %2420 = shalt.err (!%p2417_p3)
}
  0x72   : > { %s2421_s16 = scalar_lea.vmem %s2756_s15, 512  ;;  %s2535_s21 = smov [#allocation5]  }
  0x73   : > { %p2422_p5 = scmp.ne.s32.totalorder %s2756_s15, %s2421_s16  ;;  %s2426_s12 = sshll.u32 %s2535_s21, 4  ;;  %s2427_s12 = int_to_ptr.vmem [resolvable:$false] %s2426_s12 }
  0x74   : > { %s2428_s20 = scalar_lea.vmem %s2427_s12, 1024  ;;  %p2429_p0 = scmp.lt.s32.totalorder %s2756_s15, %s2427_s12 }
  0x75   : > { %p2424_p7 = pnand %p2422_p5, %p2408_p12  ;;  %p2430_p4 = scmp.lt.s32.totalorder %s2428_s20, %s2421_s16 }
  0x77   : > { %p2425_p9 = pneg %p2424_p7  ;;  %p2431_p2 = por %p2430_p4, %p2429_p0 }
  0x79   : > { %p2432_p8 = pnand %p2431_p2, %p2425_p9 }
  0x7b   : > { %2435 = shalt.err (!%p2432_p8)
}
  0x7c   : > { %2208 = dma.hbm_to_vmem [thread:$0]  (!%p2760_p11), %s2754_s10, 512, %s2756_s15, %s2764_s23, %s2533_s18, %s2533_s18, %s2534_s14  }
  0x7d   : > { %p3177_p12 = scmp.ne.s32.totalorder %s3171_s13, 0 }
  0x7e   : > { %s2798_s6 = sand.u32 (!%p3177_p12), 1, %s2510_s25   ;;  %p3178_p1 = scmp.ne.s32.totalorder (!%p3177_p12), %s3168_s11, 0 }
  0x7f   : > { %309 = sbr.rel (%p3177_p12) target bundleno = 1458 (0x5b2), region = 48  ;;  %s1586_s30 = sshll.u32 (!%p3177_p12), %s2798_s6, 5 }
  0x80   : > { %s312_s17 = scalar_lea.sflag (!%p3177_p12), [#allocation6], %s2798_s6  ;;  %s2802_s19 = scalar_lea.vmem (!%p3177_p12), [#allocation5], %s1586_s30 }
  0x86   : > { %2489 = dma.done.wait (%p3178_p1), %s312_s17, 512  }
  0x87   : > { %2491 = vsyncadd (%p3178_p1), %s312_s17, 4294966784  ;;  %p3179_p11 = scmp.ne.s32.totalorder %s3166_s9, 0 }
  0x89   : > { %2493 = dma.done.wait (%p3179_p11), [#allocation9], 6912  }
  0x8a   : > { %2495 = vsyncadd (%p3179_p11), [#allocation9], 4294960384 }
  0x8b   : > { %2497 = dma.done.wait (%p3179_p11), [#allocation12], 2048  }
  0x8c   : > { %2499 = vsyncadd (%p3179_p11), [#allocation12], 4294965248  ;;  %s2816_s13 = scalar_lea.vmem [#allocation13], %s1586_s30  ;;  %p1591_p13 = scmp.ne.s32.totalorder %s2518_s27, 0 }
  0x8d   : > { %v2536_v0 = vmov (!%p1591_p13), 0.0  }
  0x8e   : > { %363 = sbr.rel (%p1591_p13) target bundleno = 149 (0x95), region = 68  ;;  %364 = vst [vmem:[#allocation2] sm:$0xff] (!%p1591_p13), %v2536_v0 }
  0x95 PF: > { %v592_v1 = vld [vmem:[#allocation10 + $0x8] sm:$0xff]  ;;  %v595_v2 = vld [vmem:[#allocation10 + $0x20] sm:$0xff]  ;;  %v594_v5 = vld [vmem:[#allocation10 + $0x18] sm:$0xff]  ;;  %v2537_v8 = vmov 0.0   ;;  %vm392_vm0 = vcmask 130048   ;;  %v2538_v39 = vmov 0.0|0.0  }
  0x96   : > { %v591_v3 = vld [vmem:[#allocation10] sm:$0xff]  ;;  %v2819_v4 = vpack.c.bf16 %v595_v2, %v592_v1  ;;  %v598_v6 = vld [vmem:[#allocation10 + $0x38] sm:$0xff]  ;;  %v601_v7 = vld [vmem:[#allocation10 + $0x50] sm:$0xff]  ;;  %469 = vmatprep.mubr.f32.mxu1 %v2537_v8  ;;  %717 = vmatprep.mubr.f32.mxu0 %v2537_v8  ;;  %vm2539_vm1 = vmmov 0   ;;  %s3180_s22 = sld [smem:[#allocation20_spill]]  ;;  %s1616_s23 = sshll.u32 %s2518_s27, 9 }
  0x97   : > { %v2823_v9 = vpack.c.bf16 %v594_v5, %v591_v3  ;;  %v2825_v10 = vpack.c.bf16 %v601_v7, %v598_v6  ;;  %v597_v11 = vld [vmem:[#allocation10 + $0x30] sm:$0xff]  ;;  %v600_v12 = vld [vmem:[#allocation10 + $0x48] sm:$0xff]  ;;  %v370_v13 = vld [vmem:[#allocation8 + $0x8] sm:$0xff]  ;;  %s1458_s16 = sshll.u32 %s2816_s13, 4  ;;  %s3181_s20 = sld [smem:[#allocation21_spill]]  ;;  %s3097_s16 = int_to_ptr.vmem [resolvable:$true] %s1458_s16 }
  0x98   : > { %1908 = vmatprep.subr.bf16.mxu0 %v2819_v4  ;;  %v373_v14 = vld [vmem:[#allocation8 + $0x20] sm:$0xff]  ;;  %v372_v16 = vld [vmem:[#allocation8 + $0x18] sm:$0xff]  ;;  %v2829_v17 = vpack.c.bf16 %v600_v12, %v597_v11  ;;  %v607_v21 = vld [vmem:[#allocation10 + $0x80] sm:$0xff]  ;;  %s1444_s17 = scalar_lea.sflag [#allocation7], %s2798_s6  ;;  %s2540_s27 = smov [#allocation13]  }
  0x99   : > { %v369_v15 = vld [vmem:[#allocation8] sm:$0xff]  ;;  %1910 = vmatpush1.bf16.msra.mxu0 %v2823_v9  ;;  %v1899_v18 = vpack.c.bf16 %v373_v14, %v370_v13  ;;  %v604_v20 = vld [vmem:[#allocation10 + $0x68] sm:$0xff]  ;;  %v603_v23 = vld [vmem:[#allocation10 + $0x60] sm:$0xff]  ;;  %s2440_s9 = sshll.u32 %s2540_s27, 4  ;;  %s2441_s9 = int_to_ptr.vmem [resolvable:$false] %s2440_s9 }
  0x9a   : > { %v1901_v19 = vpack.c.bf16 %v372_v16, %v369_v15  ;;  %1912 = vmatprep.subr.bf16.mxu0 %v2825_v10  ;;  %v2832_v22 = vpack.c.bf16 %v607_v21, %v604_v20  ;;  %v606_v24 = vld [vmem:[#allocation10 + $0x78] sm:$0xff]  ;;  %v371_v25 = vld [vmem:[#allocation8 + $0x10] sm:$0xff]  ;;  %v613_v28 = vld [vmem:[#allocation10 + $0xb0] sm:$0xff]  ;;  %s2442_s11 = scalar_lea.vmem %s2441_s9, 1024  ;;  %p2443_p7 = scmp.lt.s32.totalorder %s3097_s16, %s2441_s9 }
  0x9b   : > { %1900 = vmatprep.subr.bf16.mxu1 %v1899_v18  ;;  %v374_v26 = vld [vmem:[#allocation8 + $0x28] sm:$0xff]  ;;  %v365_v29 = vld [vmem:[%s2802_s19] sm:$0xff]  ;;  %v2836_v31 = vpack.c.bf16 %v606_v24, %v603_v23  ;;  %v612_v34 = vld [vmem:[#allocation10 + $0xa8] sm:$0xff] }
  0x9c   : > { %v610_v27 = vld [vmem:[#allocation10 + $0x98] sm:$0xff]  ;;  %1902 = vmatpush1.bf16.msra.mxu1 %v1901_v19  ;;  %v1903_v30 = vpack.c.bf16 %v374_v26, %v371_v25  ;;  %v609_v33 = vld [vmem:[#allocation10 + $0x90] sm:$0xff]  ;;  %v616_v35 = vld [vmem:[#allocation10 + $0xc8] sm:$0xff] }
  0x9d   : > { %1914 = vmatpush1.bf16.msra.mxu0 %v2829_v17  ;;  %v2839_v32 = vpack.c.bf16 %v613_v28, %v610_v27  ;;  %v619_v36 = vld [vmem:[#allocation10 + $0xe0] sm:$0xff]  ;;  %v366_v37 = vld [vmem:[%s2802_s19 + $0x8] sm:$0xff]  ;;  %v2845_v38 = vpack.c.bf16 %v612_v34, %v609_v33  ;;  %v625_v44 = vld [vmem:[#allocation10 + $0x110] sm:$0xff]  ;;  %v377_v33 = vlaneseq  ;;  %s3095_s30 = scalar_lea.hbm %s3181_s20, %s1616_s23 }
  0x9e   : > { %1916 = vmatprep.subr.bf16.mxu0 %v2832_v22  ;;  %1904 = vmatprep.subr.bf16.mxu1 %v1903_v30  ;;  %v2849_v40 = vpack.c.bf16 %v619_v36, %v616_v35  ;;  %v615_v41 = vld [vmem:[#allocation10 + $0xc0] sm:$0xff]  ;;  %v618_v42 = vld [vmem:[#allocation10 + $0xd8] sm:$0xff]  ;;  %v621_v48 = vld [vmem:[#allocation10 + $0xf0] sm:$0xff] }
  0x9f   : > { %1592 = vmatmul.mubr.msk.f32.vlgmr.msra.gmra.mrb[0].mxu1 %vm392_vm0, %v365_v29  ;;  %v622_v43 = vld [vmem:[#allocation10 + $0xf8] sm:$0xff]  ;;  %v367_v45 = vld [vmem:[%s2802_s19 + $0x10] sm:$0xff]  ;;  %v2855_v46 = vpack.c.bf16 %v618_v42, %v615_v41  ;;  %v624_v49 = vld [vmem:[#allocation10 + $0x108] sm:$0xff]  ;;  %v378_v34 = vshrl.u32 %v377_v33, 7 }
  0xa0   : > { %1906 = vmatpush3.bf16.msra.mxu1 %v1903_v30  ;;  %475 = vmatprep.mubr.f32.mxu1 %v2537_v8  ;;  %v2858_v47 = vpack.c.bf16 %v625_v44, %v622_v43  ;;  %v628_v50 = vld [vmem:[#allocation10 + $0x128] sm:$0xff]  ;;  %v631_v51 = vld [vmem:[#allocation10 + $0x140] sm:$0xff]  ;;  %v2864_v53 = vpack.c.bf16 %v624_v49, %v621_v48  ;;  %v593_v54 = vld [vmem:[#allocation10 + $0x10] sm:$0xff] }
  0xa1   : > { %1918 = vmatpush1.bf16.msra.mxu0 %v2836_v31  ;;  %1939 = vmatprep.subr.bf16.mxu1 %v2538_v39  ;;  %v368_v52 = vld [vmem:[%s2802_s19 + $0x18] sm:$0xff]  ;;  %v2867_v56 = vpack.c.bf16 %v631_v51, %v628_v50  ;;  %v627_v57 = vld [vmem:[#allocation10 + $0x120] sm:$0xff]  ;;  %v630_v58 = vld [vmem:[#allocation10 + $0x138] sm:$0xff]  ;;  %v379_v35 = vsub.s32 0, %v378_v34  ;;  %v383_v41 = vsub.s32 1, %v378_v34  ;;  %s2436_s19 = scalar_lea.vmem %s3097_s16, 512 }
  0xa2   : > { %1920 = vmatprep.subr.bf16.mxu0 %v2839_v32  ;;  %v596_v55 = vld [vmem:[#allocation10 + $0x28] sm:$0xff]  ;;  %v634_v59 = vld [vmem:[#allocation10 + $0x158] sm:$0xff]  ;;  %v637_v60 = vld [vmem:[#allocation10 + $0x170] sm:$0xff]  ;;  %v2874_v62 = vpack.c.bf16 %v630_v58, %v627_v57  ;;  %p2437_p6 = scmp.ne.s32.totalorder %s3097_s16, %s2436_s19  ;;  %p2444_p9 = scmp.lt.s32.totalorder %s2442_s11, %s2436_s19 }
  0xa3   : > { %1593 = vmatmul.mubr.msk.f32.gmra.mrb[2].mxu1 %vm392_vm0, %v366_v37  ;;  %v2871_v61 = vpack.c.bf16 %v596_v55, %v593_v54  ;;  %v599_v63 = vld [vmem:[#allocation10 + $0x40] sm:$0xff]  ;;  %v602_v0 = vld [vmem:[#allocation10 + $0x58] sm:$0xff]  ;;  %v2877_v1 = vpack.c.bf16 %v637_v60, %v634_v59  ;;  %v633_v2 = vld [vmem:[#allocation10 + $0x150] sm:$0xff]  ;;  %v387_v55 = vsub.s32 2, %v378_v34 }
  0xa4   : > { %481 = vmatprep.mubr.f32.mxu1 %v2537_v8  ;;  %v636_v3 = vld [vmem:[#allocation10 + $0x168] sm:$0xff]  ;;  %v2881_v5 = vpack.c.bf16 %v602_v0, %v599_v63  ;;  %v605_v7 = vld [vmem:[#allocation10 + $0x70] sm:$0xff]  ;;  %v611_v14 = vld [vmem:[#allocation10 + $0xa0] sm:$0xff]  ;;  %p2438_p3 = pnand %p2437_p6, %p2737_p10  ;;  %p2445_p0 = por %p2444_p9, %p2443_p7 }
  0xa5   : > { %1922 = vmatpush1.bf16.msra.mxu0 %v2845_v38  ;;  %v2885_v6 = vpack.c.bf16 %v636_v3, %v633_v2  ;;  %v608_v11 = vld [vmem:[#allocation10 + $0x88] sm:$0xff]  ;;  %v614_v15 = vld [vmem:[#allocation10 + $0xb8] sm:$0xff]  ;;  %v617_v18 = vld [vmem:[#allocation10 + $0xd0] sm:$0xff] }
  0xa6   : > { %1924 = vmatprep.subr.bf16.mxu0 %v2849_v40  ;;  %v2891_v12 = vpack.c.bf16 %v608_v11, %v605_v7  ;;  %v2896_v13 = vld [vmem:[#allocation2] sm:$0xff]  ;;  %v2902_v16 = vpack.c.bf16 %v614_v15, %v611_v14  ;;  %v623_v21 = vld [vmem:[#allocation10 + $0x100] sm:$0xff]  ;;  %v626_v23 = vld [vmem:[#allocation10 + $0x118] sm:$0xff]  ;;  %p2439_p5 = pneg %p2438_p3 }
  0xa7   : > { %1594 = vmatmul.mubr.msk.f32.gmra.mrb[4].mxu1 %vm392_vm0, %v367_v45  ;;  %v620_v19 = vld [vmem:[#allocation10 + $0xe8] sm:$0xff]  ;;  %v2915_v24 = vpack.c.bf16 %v626_v23, %v623_v21  ;;  %v629_v25 = vld [vmem:[#allocation10 + $0x130] sm:$0xff]  ;;  %v635_v28 = vld [vmem:[#allocation10 + $0x160] sm:$0xff] }
  0xa8   : > { %487 = vmatprep.mubr.f32.mxu1 %v2537_v8  ;;  %v2909_v20 = vpack.c.bf16 %v620_v19, %v617_v18  ;;  %v632_v26 = vld [vmem:[#allocation10 + $0x148] sm:$0xff]  ;;  %p2446_p4 = pnand %p2445_p0, %p2439_p5 }
  0xa9   : > { %1926 = vmatpush1.bf16.msra.mxu0 %v2855_v46  ;;  %v2921_v27 = vpack.c.bf16 %v632_v26, %v629_v25  ;;  %v375_v36 = vld [vmem:[%s3151_s3] sm:$0x7] }
  0xaa   : > { %1928 = vmatprep.subr.bf16.mxu0 %v2858_v47  ;;  %v380_v43 = vrot.slane %v375_v36, %v379_v35  ;;  %v384_v44 = vrot.slane %v375_v36, %v383_v41  ;;  %v388_v63 = vrot.slane %v375_v36, %v387_v55  ;;  %v2983_v36 = vld [vmem:[%s3152_s4] ss:$0 sm:$0xff] }
  0xab   : > { %1595 = vmatmul.mubr.msk.f32.gmra.mrb[6].mxu1 %vm392_vm0, %v368_v52 }
  0xac   : > { %1715 = vmatprep.mubr.msk.f32.mxu1 %vm392_vm0, %v365_v29  ;;  %v638_v29 = vld [vmem:[#allocation10 + $0x178] sm:$0xff] }
  0xad   : > { %1930 = vmatpush1.bf16.msra.mxu0 %v2864_v53  ;;  %v2927_v30 = vpack.c.bf16 %v638_v29, %v635_v28 }
  0xae   : > { %1932 = vmatprep.subr.bf16.mxu0 %v2867_v56 }
  0xaf   : > { %1716 = vmatmul.mubr.msk.f32.vlgmr.msra.gmra.mrb[8].mxu1 %vm392_vm0, %v366_v37 }
  0xb0   : > { %1941 = vmatpush3.bf16.msra.mxu1 %v2871_v61  ;;  %1718 = vmatprep.mubr.msk.f32.mxu1 %vm392_vm0, %v367_v45 }
  0xb1   : > { %1934 = vmatpush1.bf16.msra.mxu0 %v2874_v62  ;;  %1942 = vmatprep.subr.bf16.mxu1 %v2538_v39 }
  0xb2   : > { %1936 = vmatprep.subr.bf16.mxu0 %v2877_v1 }
  0xb3   : > { %1719 = vmatmul.mubr.msk.f32.gmra.mrb[10].mxu1 %vm392_vm0, %v368_v52 }
  0xb4   : > { %1944 = vmatpush3.bf16.msra.mxu1 %v2881_v5  ;;  %1753 = vmatprep.mubr.msk.f32.mxu1 %vm2539_vm1, %v2537_v8 }
  0xb5   : > { %1938 = vmatpush1.bf16.msra.mxu0 %v2885_v6  ;;  %1945 = vmatprep.subr.bf16.mxu1 %v2538_v39 }
  0xb6   : > { %1964 = vmatprep.subr.bf16.mxu0 %v2819_v4 }
  0xb8   : > { %718 = vmatmul.mubr.f32.vlgmr.msra.gmra.mrb[0].mxu0 %v2896_v13  ;;  %1947 = vmatpush3.bf16.msra.mxu1 %v2891_v12 }
  0xb9   : > { %1948 = vmatprep.subr.bf16.mxu1 %v2538_v39  ;;  %1966 = vmatpush1.bf16.msra.mxu0 %v2823_v9 }
  0xba   : > { %1968 = vmatprep.subr.bf16.mxu0 %v2825_v10  ;;  %886 = vmatprep.mubr.f32.mxu0 %v2537_v8 }
  0xbc   : > { %1950 = vmatpush3.bf16.msra.mxu1 %v2902_v16 }
  0xbd   : > { %1951 = vmatprep.subr.bf16.mxu1 %v2538_v39  ;;  %1970 = vmatpush1.bf16.msra.mxu0 %v2829_v17 }
  0xbe   : > { %1972 = vmatprep.subr.bf16.mxu0 %v2832_v22 }
  0xc0   : > { %1953 = vmatpush3.bf16.msra.mxu1 %v2909_v20 }
  0xc1   : > { %1954 = vmatprep.subr.bf16.mxu1 %v2538_v39  ;;  %1974 = vmatpush1.bf16.msra.mxu0 %v2836_v31 }
  0xc2   : > { %1976 = vmatprep.subr.bf16.mxu0 %v2839_v32 }
  0xc4   : > { %1956 = vmatpush3.bf16.msra.mxu1 %v2915_v24 }
  0xc5   : > { %1957 = vmatprep.subr.bf16.mxu1 %v2538_v39  ;;  %1978 = vmatpush1.bf16.msra.mxu0 %v2845_v38 }
  0xc6   : > { %1980 = vmatprep.subr.bf16.mxu0 %v2849_v40 }
  0xc8   : > { %1959 = vmatpush3.bf16.msra.mxu1 %v2921_v27 }
  0xc9   : > { %1960 = vmatprep.subr.bf16.mxu1 %v2538_v39  ;;  %1982 = vmatpush1.bf16.msra.mxu0 %v2855_v46 }
  0xca   : > { %1984 = vmatprep.subr.bf16.mxu0 %v2858_v47 }
  0xcc   : > { %1962 = vmatpush3.bf16.msra.mxu1 %v2927_v30 }
  0xcd   : > { %1995 = vmatprep.subr.bf16.mxu1 %v2538_v39  ;;  %1986 = vmatpush1.bf16.msra.mxu0 %v2864_v53 }
  0xce   : > { %1988 = vmatprep.subr.bf16.mxu0 %v2867_v56 }
  0xcf   : > { %1754 = vmatmul.mubr.f32.vlgmr.msra.gmra.mrb[12].mxu1 %v2896_v13 }
  0xd0   : > { %1997 = vmatpush3.bf16.msra.mxu1 %v2871_v61  ;;  %1788 = vmatprep.mubr.msk.f32.mxu1 %vm2539_vm1, %v2537_v8 }
  0xd1   : > { %1998 = vmatprep.subr.bf16.mxu1 %v2538_v39  ;;  %1990 = vmatpush1.bf16.msra.mxu0 %v2874_v62 }
  0xd2   : > { %1992 = vmatprep.subr.bf16.mxu0 %v2877_v1 }
  0xd4   : > { %2000 = vmatpush3.bf16.msra.mxu1 %v2881_v5 }
  0xd5   : > { %2001 = vmatprep.subr.bf16.mxu1 %v2538_v39  ;;  %1994 = vmatpush1.bf16.msra.mxu0 %v2885_v6 }
  0xd6   : > { %2020 = vmatprep.subr.bf16.mxu0 %v2819_v4 }
  0xd8   : > { %2003 = vmatpush3.bf16.msra.mxu1 %v2891_v12 }
  0xd9   : > { %2004 = vmatprep.subr.bf16.mxu1 %v2538_v39 }
  0xdc   : > { %2006 = vmatpush3.bf16.msra.mxu1 %v2902_v16 }
  0xdd   : > { %2007 = vmatprep.subr.bf16.mxu1 %v2538_v39 }
  0xe0   : > { %2009 = vmatpush3.bf16.msra.mxu1 %v2909_v20 }
  0xe1   : > { %2010 = vmatprep.subr.bf16.mxu1 %v2538_v39 }
  0xe4   : > { %2012 = vmatpush3.bf16.msra.mxu1 %v2915_v24 }
  0xe5   : > { %2013 = vmatprep.subr.bf16.mxu1 %v2538_v39 }
  0xe8   : > { %2015 = vmatpush3.bf16.msra.mxu1 %v2921_v27 }
  0xe9   : > { %2016 = vmatprep.subr.bf16.mxu1 %v2538_v39 }
  0xec   : > { %2018 = vmatpush3.bf16.msra.mxu1 %v2927_v30 }
  0xed   : > { %2051 = vmatprep.subr.bf16.mxu1 %v2538_v39 }
 0x172   : > { %v471_v37 = vpop.f32.mrb[0].mxu1 }
 0x173   : > { %v473_v42 = vpop.f32.mrb[1].mxu1  ;;  %v472_v19 = vadd.f32 %v471_v37, %v380_v43 }
 0x174   : > { %v474_v21 = vadd.f32 %v473_v42, %v384_v44 }
 0x176   : > { %v477_v45 = vpop.f32.mrb[2].mxu1 }
 0x177   : > { %v2962_v48 = vadd.f32 %v477_v45, %v380_v43  ;;  %v479_v49 = vpop.f32.mrb[3].mxu1 }
 0x178   : > { %v2964_v50 = vadd.f32 %v479_v49, %v384_v44 }
 0x17a   : > { %v483_v51 = vpop.f32.mrb[4].mxu1 }
 0x17b   : > { %v2966_v52 = vadd.f32 %v483_v51, %v380_v43  ;;  %v485_v54 = vpop.f32.mrb[5].mxu1 }
 0x17c   : > { %v2968_v57 = vadd.f32 %v485_v54, %v384_v44 }
 0x17e   : > { %v489_v58 = vpop.f32.mrb[6].mxu1 }
 0x17f   : > { %v2970_v59 = vadd.f32 %v489_v58, %v380_v43  ;;  %v491_v60 = vpop.f32.mrb[7].mxu1 }
 0x180   : > { %v2972_v0 = vadd.f32 %v491_v60, %v384_v44 }
 0x182   : > { %v1717_v2 = vpop.f32.mrb[8].mxu1 }
 0x183   : > { %v2974_v3 = vadd.f32 %v1717_v2, %v388_v63  ;;  %v560_v7 = vpop.f32.mrb[9].mxu1 }
 0x184   : > { %v561_v44 = vadd.f32 %v560_v7, %v388_v63 }
 0x186   : > { %v1720_v11 = vpop.f32.mrb[10].mxu1 }
 0x187   : > { %v2976_v14 = vadd.f32 %v1720_v11, %v388_v63  ;;  %v570_v15 = vpop.f32.mrb[11].mxu1 }
 0x188   : > { %v2978_v18 = vadd.f32 %v570_v15, %v388_v63 }
 0x18b   : > { %v719_v23 = vpop.f32.mrb[0].mxu0 }
 0x18c   : > { %v794_v25 = vadd.f32 %v719_v23, %v472_v19  ;;  %v721_v26 = vpop.f32.mrb[1].mxu0 }
 0x18d   : > { %v801_v28 = vadd.f32 %v721_v26, %v474_v21 }
 0x18e   : > { %v1601_v29 = vmul.f32 -1.442695, %v794_v25 }
 0x18f   : > { %v1602_v33 = vmul.f32 -1.442695, %v801_v28 }
 0x190   : > { %2282 = vpow2.f32 %v1601_v29 }
 0x191   : > { %2284 = vpow2.f32 %v1602_v33 }
 0x19a   : > { %v2283_v34 = vpop.eup %2282 }
 0x19b   : > { %v798_v35 = vadd.f32 1.0, %v2283_v34  ;;  %v2285_v42 = vpop.eup %2284 }
 0x19c   : > { %v805_v51 = vadd.f32 1.0, %v2285_v42 }
 0x19d   : > { %2286 = vrcp.f32 %v798_v35 }
 0x1a2   : > { %v790_v41 = vpop.f32.mrb[12].mxu1 }
 0x1a3   : > { %v1755_v45 = vpop.f32.mrb[13].mxu1  ;;  %v808_v37 = vadd.f32 %v2983_v36, %v790_v41 }
 0x1a7   : > { %v2287_v43 = vpop.eup %2286 }
 0x1a8   : > { %v809_v49 = vmul.f32 %v2287_v43, %v808_v37  ;;  %v1336_v43 = vld [vmem:[#allocation11 + $0x28] sm:$0xff] }
 0x1aa   : > { %v810_v54 = vadd.f32 %v809_v49, %v561_v44  ;;  %v1337_v44 = vld [vmem:[#allocation11 + $0x30] sm:$0xff]  ;;  %v1338_v49 = vld [vmem:[#allocation11 + $0x38] sm:$0xff] }
 0x1ac   : > { %2288 = vtanh.f32 %v810_v54  ;;  %v1339_v54 = vld [vmem:[#allocation11 + $0x40] sm:$0xff] }
 0x1ad   : > { %2290 = vrcp.f32 %v805_v51  ;;  %v2143_v51 = vpack.c.bf16 %v1338_v49, %v1337_v44 }
 0x1b6   : > { %v2289_v55 = vpop.eup %2288 }
 0x1b7   : > { %v812_v58 = vsub.f32 %v2896_v13, %v2289_v55  ;;  %v2291_v60 = vpop.eup %2290 }
 0x1b9   : > { %v813_v2 = vmul.f32 %v2291_v60, %v812_v58  ;;  %v1341_v60 = vld [vmem:[#allocation11 + $0x50] sm:$0xff] }
 0x1bb   : > { %v2987_v11 = vadd.f32 %v2289_v55, %v813_v2  ;;  %v1340_v55 = vld [vmem:[#allocation11 + $0x48] sm:$0xff]  ;;  %v1342_v2 = vld [vmem:[#allocation11 + $0x58] sm:$0xff] }
 0x1bc   : > { %v2147_v58 = vpack.c.bf16 %v1340_v55, %v1339_v54 }
 0x1bd   : > { %887 = vmatmul.mubr.f32.vlgmr.msra.gmra.mrb[2].mxu0 %v2987_v11  ;;  %1789 = vmatmul.mubr.f32.vlgmr.msra.gmra.mrb[14].mxu1 %v2987_v11 }
 0x1be   : > { %2022 = vmatpush1.bf16.msra.mxu0 %v2823_v9  ;;  %2053 = vmatpush3.bf16.msra.mxu1 %v2871_v61 }
 0x1bf   : > { %2024 = vmatprep.subr.bf16.mxu0 %v2825_v10  ;;  %2054 = vmatprep.subr.bf16.mxu1 %v2538_v39 }
 0x1c0   : > { %1056 = vmatprep.mubr.f32.mxu0 %v2537_v8  ;;  %1823 = vmatprep.mubr.msk.f32.mxu1 %vm2539_vm1, %v2537_v8 }
 0x1c2   : > { %2026 = vmatpush1.bf16.msra.mxu0 %v2829_v17  ;;  %2056 = vmatpush3.bf16.msra.mxu1 %v2881_v5 }
 0x1c3   : > { %2028 = vmatprep.subr.bf16.mxu0 %v2832_v22  ;;  %2057 = vmatprep.subr.bf16.mxu1 %v2538_v39 }
 0x1c6   : > { %2030 = vmatpush1.bf16.msra.mxu0 %v2836_v31  ;;  %2059 = vmatpush3.bf16.msra.mxu1 %v2891_v12 }
 0x1c7   : > { %2032 = vmatprep.subr.bf16.mxu0 %v2839_v32  ;;  %2060 = vmatprep.subr.bf16.mxu1 %v2538_v39 }
 0x1ca   : > { %2034 = vmatpush1.bf16.msra.mxu0 %v2845_v38  ;;  %2062 = vmatpush3.bf16.msra.mxu1 %v2902_v16 }
 0x1cb   : > { %2036 = vmatprep.subr.bf16.mxu0 %v2849_v40  ;;  %2063 = vmatprep.subr.bf16.mxu1 %v2538_v39 }
 0x1ce   : > { %2038 = vmatpush1.bf16.msra.mxu0 %v2855_v46  ;;  %2065 = vmatpush3.bf16.msra.mxu1 %v2909_v20 }
 0x1cf   : > { %2040 = vmatprep.subr.bf16.mxu0 %v2858_v47  ;;  %2066 = vmatprep.subr.bf16.mxu1 %v2538_v39 }
 0x1d2   : > { %2042 = vmatpush1.bf16.msra.mxu0 %v2864_v53  ;;  %2068 = vmatpush3.bf16.msra.mxu1 %v2915_v24 }
 0x1d3   : > { %2044 = vmatprep.subr.bf16.mxu0 %v2867_v56  ;;  %2069 = vmatprep.subr.bf16.mxu1 %v2538_v39 }
 0x1d6   : > { %2046 = vmatpush1.bf16.msra.mxu0 %v2874_v62  ;;  %2071 = vmatpush3.bf16.msra.mxu1 %v2921_v27 }
 0x1d7   : > { %2048 = vmatprep.subr.bf16.mxu0 %v2877_v1  ;;  %2072 = vmatprep.subr.bf16.mxu1 %v2538_v39 }
 0x1da   : > { %2050 = vmatpush1.bf16.msra.mxu0 %v2885_v6  ;;  %2074 = vmatpush3.bf16.msra.mxu1 %v2927_v30 }
 0x1db   : > { %2076 = vmatprep.subr.bf16.mxu0 %v2819_v4  ;;  %2107 = vmatprep.subr.bf16.mxu1 %v2538_v39 }
 0x290   : > { %v888_v13 = vpop.f32.mrb[2].mxu0  ;;  %v959_v63 = vpop.f32.mrb[14].mxu1 }
 0x291   : > { %v963_v7 = vadd.f32 %v888_v13, %v2962_v48  ;;  %v890_v15 = vpop.f32.mrb[3].mxu0  ;;  %v1790_v19 = vpop.f32.mrb[15].mxu1  ;;  %v977_v4 = vadd.f32 %v2983_v36, %v959_v63  ;;  %v2151_v13 = vpack.c.bf16 %v1342_v2, %v1341_v60  ;;  %v1343_v63 = vld [vmem:[#allocation11 + $0x60] sm:$0xff] }
 0x292   : > { %v970_v21 = vadd.f32 %v890_v15, %v2964_v50  ;;  %v1345_v15 = vld [vmem:[#allocation11 + $0x70] sm:$0xff]  ;;  %v1346_v19 = vld [vmem:[#allocation11 + $0x78] sm:$0xff] }
 0x293   : > { %v1603_v23 = vmul.f32 -1.442695, %v963_v7  ;;  %v1344_v7 = vld [vmem:[#allocation11 + $0x68] sm:$0xff] }
 0x294   : > { %v1604_v25 = vmul.f32 -1.442695, %v970_v21  ;;  %v2159_v21 = vpack.c.bf16 %v1346_v19, %v1345_v15 }
 0x295   : > { %2292 = vpow2.f32 %v1603_v23 }
 0x296   : > { %2294 = vpow2.f32 %v1604_v25 }
 0x29f   : > { %v2293_v26 = vpop.eup %2292 }
 0x2a0   : > { %v967_v28 = vadd.f32 1.0, %v2293_v26  ;;  %v2295_v29 = vpop.eup %2294 }
 0x2a1   : > { %v974_v41 = vadd.f32 1.0, %v2295_v29 }
 0x2a2   : > { %2296 = vrcp.f32 %v967_v28 }
 0x2ac   : > { %v2297_v33 = vpop.eup %2296 }
 0x2ad   : > { %v978_v34 = vmul.f32 %v2297_v33, %v977_v4 }
 0x2af   : > { %v979_v35 = vadd.f32 %v978_v34, %v2974_v3  ;;  %v1335_v3 = vld [vmem:[#allocation11 + $0x20] sm:$0xff] }
 0x2b1   : > { %2298 = vtanh.f32 %v979_v35 }
 0x2b2   : > { %2300 = vrcp.f32 %v974_v41 }
 0x2bb   : > { %v2299_v48 = vpop.eup %2298 }
 0x2bc   : > { %v981_v50 = vsub.f32 %v2987_v11, %v2299_v48  ;;  %v2301_v45 = vpop.eup %2300 }
 0x2be   : > { %v982_v37 = vmul.f32 %v2301_v45, %v981_v50 }
 0x2c0   : > { %v3031_v42 = vadd.f32 %v2299_v48, %v982_v37 }
 0x2c2   : > { %1057 = vmatmul.mubr.f32.vlgmr.msra.gmra.mrb[4].mxu0 %v3031_v42  ;;  %1824 = vmatmul.mubr.f32.vlgmr.msra.gmra.mrb[16].mxu1 %v3031_v42 }
 0x2c3   : > { %2078 = vmatpush1.bf16.msra.mxu0 %v2823_v9  ;;  %2109 = vmatpush3.bf16.msra.mxu1 %v2871_v61  ;;  %v1332_v9 = vld [vmem:[#allocation11 + $0x8] sm:$0xff] }
 0x2c4   : > { %2080 = vmatprep.subr.bf16.mxu0 %v2825_v10  ;;  %2110 = vmatprep.subr.bf16.mxu1 %v2538_v39 }
 0x2c5   : > { %1226 = vmatprep.mubr.f32.mxu0 %v2537_v8  ;;  %1858 = vmatprep.mubr.msk.f32.mxu1 %vm2539_vm1, %v2537_v8  ;;  %v1331_v8 = vld [vmem:[#allocation11] sm:$0xff] }
 0x2c6   : > { %v2131_v10 = vpack.c.bf16 %v1332_v9, %v1331_v8 }
 0x2c7   : > { %2082 = vmatpush1.bf16.msra.mxu0 %v2829_v17  ;;  %2112 = vmatpush3.bf16.msra.mxu1 %v2881_v5 }
 0x2c8   : > { %2084 = vmatprep.subr.bf16.mxu0 %v2832_v22  ;;  %2113 = vmatprep.subr.bf16.mxu1 %v2538_v39 }
 0x2cb   : > { %2086 = vmatpush1.bf16.msra.mxu0 %v2836_v31  ;;  %2115 = vmatpush3.bf16.msra.mxu1 %v2891_v12 }
 0x2cc   : > { %2088 = vmatprep.subr.bf16.mxu0 %v2839_v32  ;;  %2116 = vmatprep.subr.bf16.mxu1 %v2538_v39 }
 0x2cf   : > { %2090 = vmatpush1.bf16.msra.mxu0 %v2845_v38  ;;  %2118 = vmatpush3.bf16.msra.mxu1 %v2902_v16 }
 0x2d0   : > { %2092 = vmatprep.subr.bf16.mxu0 %v2849_v40  ;;  %2119 = vmatprep.subr.bf16.mxu1 %v2538_v39 }
 0x2d3   : > { %2094 = vmatpush1.bf16.msra.mxu0 %v2855_v46  ;;  %2121 = vmatpush3.bf16.msra.mxu1 %v2909_v20 }
 0x2d4   : > { %2096 = vmatprep.subr.bf16.mxu0 %v2858_v47  ;;  %2122 = vmatprep.subr.bf16.mxu1 %v2538_v39 }
 0x2d7   : > { %2098 = vmatpush1.bf16.msra.mxu0 %v2864_v53  ;;  %2124 = vmatpush3.bf16.msra.mxu1 %v2915_v24  ;;  %v1333_v24 = vld [vmem:[#allocation11 + $0x10] sm:$0xff] }
 0x2d8   : > { %2100 = vmatprep.subr.bf16.mxu0 %v2867_v56  ;;  %2125 = vmatprep.subr.bf16.mxu1 %v2538_v39 }
 0x2db   : > { %2102 = vmatpush1.bf16.msra.mxu0 %v2874_v62  ;;  %2127 = vmatpush3.bf16.msra.mxu1 %v2921_v27  ;;  %v1334_v27 = vld [vmem:[#allocation11 + $0x18] sm:$0xff] }
 0x2dc   : > { %2104 = vmatprep.subr.bf16.mxu0 %v2877_v1  ;;  %2128 = vmatprep.subr.bf16.mxu1 %v2538_v39 }
 0x2df   : > { %2106 = vmatpush1.bf16.msra.mxu0 %v2885_v6  ;;  %2130 = vmatpush3.bf16.msra.mxu1 %v2927_v30 }
 0x2e0   : > { %2132 = vmatprep.subr.bf16.mxu0 %v2131_v10 }
 0x395   : > { %v1058_v17 = vpop.f32.mrb[4].mxu0  ;;  %v1129_v22 = vpop.f32.mrb[16].mxu1 }
 0x396   : > { %v1133_v31 = vadd.f32 %v1058_v17, %v2966_v52  ;;  %v1060_v32 = vpop.f32.mrb[5].mxu0  ;;  %v1825_v38 = vpop.f32.mrb[17].mxu1  ;;  %v1147_v61 = vadd.f32 %v2983_v36, %v1129_v22 }
 0x397   : > { %v1140_v40 = vadd.f32 %v1060_v32, %v2968_v57  ;;  %v2135_v57 = vpack.c.bf16 %v1334_v27, %v1333_v24 }
 0x398   : > { %v1605_v46 = vmul.f32 -1.442695, %v1133_v31 }
 0x399   : > { %v1606_v47 = vmul.f32 -1.442695, %v1140_v40 }
 0x39a   : > { %2302 = vpow2.f32 %v1605_v46 }
 0x39b   : > { %2304 = vpow2.f32 %v1606_v47 }
 0x3a4   : > { %v2303_v39 = vpop.eup %2302 }
 0x3a5   : > { %v1137_v53 = vadd.f32 1.0, %v2303_v39  ;;  %v2305_v56 = vpop.eup %2304 }
 0x3a6   : > { %v1144_v6 = vadd.f32 1.0, %v2305_v56 }
 0x3a7   : > { %2306 = vrcp.f32 %v1137_v53 }
 0x3b1   : > { %v2307_v62 = vpop.eup %2306 }
 0x3b2   : > { %v1148_v1 = vmul.f32 %v2307_v62, %v1147_v61 }
 0x3b4   : > { %v1149_v5 = vadd.f32 %v1148_v1, %v2978_v18  ;;  %v2139_v18 = vpack.c.bf16 %v1336_v43, %v1335_v3 }
 0x3b6   : > { %2308 = vtanh.f32 %v1149_v5 }
 0x3b7   : > { %2310 = vrcp.f32 %v1144_v6 }
 0x3c0   : > { %v2309_v12 = vpop.eup %2308 }
 0x3c1   : > { %v1151_v16 = vsub.f32 %v3031_v42, %v2309_v12  ;;  %v2311_v20 = vpop.eup %2310 }
 0x3c3   : > { %v1152_v30 = vmul.f32 %v2311_v20, %v1151_v16 }
 0x3c5   : > { %v3073_v52 = vadd.f32 %v2309_v12, %v1152_v30 }
 0x3c7   : > { %1227 = vmatmul.mubr.f32.vlgmr.msra.gmra.mrb[6].mxu0 %v3073_v52  ;;  %1859 = vmatmul.mubr.f32.vlgmr.msra.gmra.mrb[18].mxu1 %v3073_v52 }
 0x3c8   : > { %2134 = vmatpush3.bf16.msra.mxu0 %v2131_v10  ;;  %1893 = vmatprep.mubr.f32.mxu0 %v2987_v11  ;;  %v2155_v11 = vpack.c.bf16 %v1344_v7, %v1343_v63 }
 0x3c9   : > { %2136 = vmatprep.subr.bf16.mxu0 %v2135_v57 }
 0x3cc   : > { %2138 = vmatpush3.bf16.msra.mxu0 %v2135_v57 }
 0x3cd   : > { %2140 = vmatprep.subr.bf16.mxu0 %v2139_v18 }
 0x3d0   : > { %2142 = vmatpush3.bf16.msra.mxu0 %v2139_v18 }
 0x3d1   : > { %2144 = vmatprep.subr.bf16.mxu0 %v2143_v51 }
 0x3d4   : > { %2146 = vmatpush3.bf16.msra.mxu0 %v2143_v51 }
 0x3d5   : > { %2148 = vmatprep.subr.bf16.mxu0 %v2147_v58 }
 0x3d8   : > { %2150 = vmatpush3.bf16.msra.mxu0 %v2147_v58 }
 0x3d9   : > { %2152 = vmatprep.subr.bf16.mxu0 %v2151_v13 }
 0x3dc   : > { %2154 = vmatpush3.bf16.msra.mxu0 %v2151_v13 }
 0x3dd   : > { %2156 = vmatprep.subr.bf16.mxu0 %v2155_v11 }
 0x3e0   : > { %2158 = vmatpush3.bf16.msra.mxu0 %v2155_v11 }
 0x3e1   : > { %2160 = vmatprep.subr.bf16.mxu0 %v2159_v21 }
 0x3e4   : > { %2162 = vmatpush3.bf16.msra.mxu0 %v2159_v21 }
 0x3e7   : > { %1894 = vmatmul.mubr.f32.vlgmr.msra.gmra.mrb[8].mxu0 %v3031_v42 }
 0x3e8   : > { %1896 = vmatprep.mubr.f32.mxu0 %v3073_v52 }
 0x49a   : > { %v1228_v23 = vpop.f32.mrb[6].mxu0  ;;  %v1299_v25 = vpop.f32.mrb[18].mxu1 }
 0x49b   : > { %v1303_v26 = vadd.f32 %v1228_v23, %v2970_v59  ;;  %v1230_v28 = vpop.f32.mrb[7].mxu0  ;;  %v1860_v29 = vpop.f32.mrb[19].mxu1  ;;  %v1317_v50 = vadd.f32 %v2983_v36, %v1299_v25  ;;  %v1609_v59 = vld [vmem:[%s3180_s22] ss:$0 sm:$0xff] }
 0x49c   : > { %v1310_v4 = vadd.f32 %v1230_v28, %v2972_v0 }
 0x49d   : > { %v1607_v33 = vmul.f32 -1.442695, %v1303_v26 }
 0x49e   : > { %v1608_v34 = vmul.f32 -1.442695, %v1310_v4 }
 0x49f   : > { %2312 = vpow2.f32 %v1607_v33 }
 0x4a0   : > { %2314 = vpow2.f32 %v1608_v34 }
 0x4a9   : > { %v2313_v35 = vpop.eup %2312 }
 0x4aa   : > { %v1307_v41 = vadd.f32 1.0, %v2313_v35  ;;  %v2315_v48 = vpop.eup %2314 }
 0x4ab   : > { %v1314_v42 = vadd.f32 1.0, %v2315_v48 }
 0x4ac   : > { %2316 = vrcp.f32 %v1307_v41 }
 0x4b6   : > { %v2317_v45 = vpop.eup %2316 }
 0x4b7   : > { %v1318_v37 = vmul.f32 %v2317_v45, %v1317_v50 }
 0x4b9   : > { %v1319_v0 = vadd.f32 %v1318_v37, %v2976_v14 }
 0x4ba   : > { %v1895_v8 = vpop.f32.mrb[8].mxu0 }
 0x4bb   : > { %2318 = vtanh.f32 %v1319_v0  ;;  %v1426_v9 = vadd.f32 %v1895_v8, %v1609_v59  ;;  %v1420_v10 = vpop.f32.mrb[9].mxu0 }
 0x4bc   : > { %v1421_v17 = vadd.f32 %v1609_v59, %v1420_v10  ;;  %2320 = vrcp.f32 %v1314_v42 }
 0x4bd   : > { %1440 = vst [vmem:[%s2816_s13 + $0x8] sm:$0xff] %v1426_v9 }
 0x4be   : > { %1439 = vst [vmem:[%s2816_s13] sm:$0xff] %v1421_v17 }
 0x4c5   : > { %v2319_v36 = vpop.eup %2318 }
 0x4c6   : > { %v1321_v22 = vsub.f32 %v3073_v52, %v2319_v36  ;;  %v2321_v31 = vpop.eup %2320 }
 0x4c8   : > { %v1322_v32 = vmul.f32 %v2321_v31, %v1321_v22 }
 0x4ca   : > { %v1323_v14 = vadd.f32 %v2319_v36, %v1322_v32 }
 0x4cc   : > { %1326 = vst [vmem:[#allocation2] sm:$0xff] %v1323_v14  ;;  %1897 = vmatmul.mubr.f32.gmra.mrb[10].mxu0 %v1323_v14 }
 0x59f   : > { %v1898_v38 = vpop.f32.mrb[10].mxu0 }
 0x5a0   : > { %v1436_v40 = vadd.f32 %v1898_v38, %v1609_v59  ;;  %v1430_v46 = vpop.f32.mrb[11].mxu0 }
 0x5a1   : > { %v1431_v47 = vadd.f32 %v1609_v59, %v1430_v46 }
 0x5a2   : > { %1442 = vst [vmem:[%s2816_s13 + $0x18] sm:$0xff] %v1436_v40 }
 0x5a3   : > { %1441 = vst [vmem:[%s2816_s13 + $0x10] sm:$0xff] %v1431_v47 }
 0x5a4   : > { %2449 = shalt.err (!%p2446_p4)
}
 0x5a5   : > { %s2450_s13 = scalar_lea.hbm %s3095_s30, 512  ;;  %s2454_s10 = scalar_lea.hbm %s3181_s20, 1024 }
 0x5a6   : > { %p2451_p2 = scmp.ne.s32.totalorder %s3095_s30, %s2450_s13  ;;  %p2455_p1 = scmp.lt.u32.totalorder %s3095_s30, %s3181_s20 }
 0x5a7   : > { %p2456_p11 = scmp.lt.u32.totalorder %s2454_s10, %s2450_s13  ;;  %p2458_p6 = scmp.lt.u32.totalorder %s2450_s13, %s3095_s30 }
 0x5a8   : > { %p2452_p8 = pnand %p2451_p2, %p2737_p10 }
 0x5a9   : > { %p2457_p13 = por %p2456_p11, %p2455_p1 }
 0x5aa   : > { %p2453_p12 = pneg %p2452_p8 }
 0x5ab   : > { %p2459_p3 = por %p2458_p6, %p2457_p13 }
 0x5ad   : > { %p2460_p5 = pnand %p2459_p3, %p2453_p12 }
 0x5af   : > { %2463 = shalt.err (!%p2460_p5)
}
 0x5b0   : > { %s2541_s23 = smov 128   ;;  %s2542_s21 = smov 8  }
 0x5b1   : > { %2193 = dma.vmem_to_hbm [thread:$0]  (%p2737_p10), %s3097_s16, 512, %s3095_s30, %s1444_s17, %s2541_s23, %s2541_s23, %s2542_s21  }
 0x5b2 PF: > { %s3182_s12 = sld [smem:[#allocation18_spill]]  ;;  %s3183_s19 = sld [smem:[#allocation19_spill]] }
 0x5b3   : > { %p3185_p9 = scmp.ge.s32.totalorder %s2526_s29, 2 }
 0x5b8   : > { %s1473_s27 = sand.u32 1, %s3182_s12   ;;  %p3184_p7 = scmp.ne.s32.totalorder %s3183_s19, 0 }
 0x5b9   : > { %s1474_s9 = scalar_lea.sflag [#allocation7], %s1473_s27 }
 0x5ba   : > { %p2210_p0 = pnand %p3185_p9, %p3184_p7 }
 0x5bc   : > { %2501 = dma.done.wait (!%p2210_p0), %s1474_s9, 512  }
 0x5bd   : > { %2503 = vsyncadd (!%p2210_p0), %s1474_s9, 4294966784  ;;  %s25_s29 = sadd.s32 1, %s2526_s29   ;;  %s3186_s24 = smov %s2510_s25 }
 0x5be   : > { %p22_p4 = scmp.ge.s32.totalorder %s25_s29, 4   ;;  %s3187_s25 = smov %s2514_s26 }
 0x5bf   : > { %s3188_s26 = smov %s2749_s8  ;;  %s3189_s27 = smov %s2522_s28 }
 0x5c0   : > { %s3190_s28 = smov %s3192_s7  ;;  %24 = sbr.rel (!%p22_p4) target bundleno = 11 (0xb), region = 116 }
 0x5c7   :  { %1479 = vsyncpa [#allocation6], 1 }
 0x5c8   :  { %1481 = vsyncpa [#allocation6 + $0x1], 1 }
 0x5c9   :  { %1482 = vsyncpa [#allocation9], 1 }
 0x5ca   :  { %1483 = vsyncpa [#allocation12], 1 }
 0x5cb   :  { %1484 = vsyncpa [#allocation7], 1 }
 0x5cc   :  { %1486 = vsyncpa [#allocation7 + $0x1], 1 }

</bundles_post_ra>
